<compile_context>
chip_gen: v6e
topology: v6e:2x2x1
jax: 0.10.0
libtpu: 0.0.40
codegen_flags: <defaults>
</compile_context>

<pallas_src>
import jax
import jax.numpy as jnp
from jax.experimental import pallas as pl
from jax.experimental.pallas import tpu as pltpu


def _round_up(x, m):
    return ((x + m - 1) // m) * m


def _cdiv(a, b):
    return (a + b - 1) // b


def _softplus(x):
    # numerically stable softplus == torch.nn.Softplus default (beta=1)
    return jnp.maximum(x, 0.0) + jnp.log1p(jnp.exp(-jnp.abs(x)))


def pomelo_kernel(x_ref, w1_ref, b1_ref, w2_ref, b2_ref, w3_ref, b3_ref,
                  w4_ref, b4_ref, out_ref):
    """One grid step = `tile_hw` pixels of one batch element, channel-major.

    x_ref:   (1, 5, tile_hw)  f32   -- channel 0 = buildings, channels 1:5 = data
    w1_ref:  (128, 4)   f32         -- layer-1 weight (VPU path, exact f32)
    w2_ref:  (128, 128) compute_dtype
    w3_ref:  (128, 128) compute_dtype
    w4_ref:  (128, 1)   f32         -- head weight column (VPU path, exact f32)
    b*_ref:  (128, 1) / (1, 1) f32
    out_ref: (1, 1, 128)  f32       -- lane-dense per-tile partial sum of pop_est
    """
    x = x_ref[0]                                   # (5, tile_hw) f32
    x = jnp.where(x > 1e32, 0.0, x)                # inputs[inputs > 1e32] = 0
    bld = x[0:1, :]                                # (1, tile_hw) buildings channel

    # ---- Layer 1 (4 -> 128): VPU broadcast multiply-adds, exact f32 (no MXU pass). ----
    w1 = w1_ref[...]                               # (128, 4)
    h = b1_ref[...] + w1[:, 0:1] * x[1:2, :]
    h = h + w1[:, 1:2] * x[2:3, :]
    h = h + w1[:, 2:3] * x[3:4, :]
    h = h + w1[:, 3:4] * x[4:5, :]
    h = jnp.maximum(h, 0.0)                        # (128, tile_hw) f32

    # ---- Layers 2-3 (128 -> 128): MXU, bf16 operands by default, f32 accumulation. ----
    h = jnp.dot(w2_ref[...], h.astype(w2_ref.dtype),
                preferred_element_type=jnp.float32) + b2_ref[...]
    h = jnp.maximum(h, 0.0)
    h = jnp.dot(w3_ref[...], h.astype(w3_ref.dtype),
                preferred_element_type=jnp.float32) + b3_ref[...]
    h = jnp.maximum(h, 0.0)                        # (128, tile_hw) f32

    # ---- Head (128 -> 1): VPU multiply + sublane reduce in f32 (off the MXU). ----
    z = jnp.sum(h * w4_ref[...], axis=0, keepdims=True) + b4_ref[...]   # (1, tile_hw)
    occrate = _softplus(z)

    # pop_est = buildings * occrate
    pop = bld * occrate                            # (1, tile_hw) f32

    # ---- In-kernel partial reduce to a lane-dense (1, 128) row. ----
    # 128-lane-aligned static slices -> unmasked, no relayout; final sum is done outside.
    tile_hw = pop.shape[1]
    partial = pop[:, 0:128]
    for k in range(1, tile_hw // 128):
        partial = partial + pop[:, k * 128:(k + 1) * 128]
    out_ref[0] = partial


def pomelo_forward(inputs_nchw, params, *, tile_hw=1024, compute_dtype=jnp.bfloat16):
    """inputs_nchw: (B, 5, H, W) float32.  Returns (1,) float32 = pop_est.sum((0,2,3))."""
    B, C, H, W = inputs_nchw.shape
    assert C == 5, "channels_in=5 (1 building channel + 4 data channels)"
    w1, b1, w2, b2, w3, b3, w4, b4 = params
    cin, nh = w1.shape                              # (4, 128)

    HW = H * W
    # Lane tile: multiple of 128, capped at the (128-rounded) spatial extent.
    tile_hw = min(int(tile_hw), _round_up(HW, 128))
    tile_hw = max(128, (tile_hw // 128) * 128)
    # v7x megacore: keep >= 2 grid steps whenever the problem allows it (B==1 case).
    if B * _cdiv(HW, tile_hw) < 2 and HW > 128:
        tile_hw = max(128, _round_up(_cdiv(HW, 2), 128))
    HWp = _round_up(HW, tile_hw)
    nt = HWp // tile_hw
    G = B * nt

    # Free, contiguous reshape NCHW -> (B, C, H*W).  No transpose / slice copies in HBM.
    x = inputs_nchw.reshape(B, C, HW)
    if HWp != HW:
        # Zero padding is safe: padded buildings are 0, so padded pop contributions are 0.
        x = jnp.pad(x, ((0, 0), (0, 0), (0, HWp - HW)))

    # Channel-major weights.  Layers 1 and 4 run on the VPU in exact f32; layers 2-3 are
    # stored in compute_dtype (bf16 default) so the MXU runs native bf16, f32 accumulate.
    w1t = jnp.asarray(w1.T, jnp.float32)            # (nh, cin)
    w2t = jnp.asarray(w2.T, compute_dtype)          # (nh, nh)
    w3t = jnp.asarray(w3.T, compute_dtype)          # (nh, nh)
    w4c = jnp.asarray(w4.reshape(nh, 1), jnp.float32)   # (nh, 1) head column, f32
    b1c = jnp.asarray(b1.reshape(nh, 1), jnp.float32)
    b2c = jnp.asarray(b2.reshape(nh, 1), jnp.float32)
    b3c = jnp.asarray(b3.reshape(nh, 1), jnp.float32)
    b4c = jnp.asarray(b4.reshape(1, 1), jnp.float32)

    const = lambda b, t: (0, 0)
    n_pix = B * HWp
    itemsize = jnp.finfo(compute_dtype).bits // 8
    weight_bytes = ((cin * nh + nh) * 4                       # W1^T, b1 (f32)
                    + 2 * nh * nh * itemsize                  # W2^T, W3^T
                    + (nh + 1) * 4                            # w4 column, b4 (f32)
                    + 2 * nh * 4)                             # b2, b3 (f32)
    cost = pl.CostEstimate(
        flops=2 * n_pix * (cin * nh + nh * nh + nh * nh + nh),
        transcendentals=2 * n_pix,                            # exp + log1p in softplus
        bytes_accessed=B * C * HWp * 4 + weight_bytes + G * 128 * 4,
    )

    partials = pl.pallas_call(
        pomelo_kernel,
        out_shape=jax.ShapeDtypeStruct((G, 1, 128), jnp.float32),
        grid_spec=pltpu.PrefetchScalarGridSpec(
            num_scalar_prefetch=0,
            grid=(B, nt),
            in_specs=[
                pl.BlockSpec((1, C, tile_hw), lambda b, t: (b, 0, t)),  # inputs
                pl.BlockSpec((nh, cin), const),     # W1^T (f32, VPU layer)
                pl.BlockSpec((nh, 1), const),       # b1
                pl.BlockSpec((nh, nh), const),      # W2^T
                pl.BlockSpec((nh, 1), const),       # b2
                pl.BlockSpec((nh, nh), const),      # W3^T
                pl.BlockSpec((nh, 1), const),       # b3
                pl.BlockSpec((nh, 1), const),       # w4 column (f32, VPU head)
                pl.BlockSpec((1, 1), const),        # b4
            ],
            out_specs=pl.BlockSpec((1, 1, 128), lambda b, t: (b * nt + t, 0, 0)),
        ),
        compiler_params=pltpu.CompilerParams(
            dimension_semantics=("parallel", "parallel")),   # independent tiles -> megacore
        cost_estimate=cost,
    )(x, w1t, b1c, w2t, b2c, w3t, b3c, w4c, b4c)

    # Final global reduce (tiny: G*128 floats) outside the kernel; padded pixels are 0.
    return jnp.sum(partials).reshape(1)


def init_params(key, cin=4, n_hidden=128):
    """Deterministic init mimicking PyTorch Conv2d default (uniform ±1/sqrt(fan_in))."""
    ks = jax.random.split(key, 8)

    def u(k, shape, fan_in):
        lim = 1.0 / jnp.sqrt(fan_in)
        return jax.random.uniform(k, shape, jnp.float32, -lim, lim)

    w1 = u(ks[0], (cin, n_hidden), cin)
    b1 = u(ks[1], (1, n_hidden), cin)
    w2 = u(ks[2], (n_hidden, n_hidden), n_hidden)
    b2 = u(ks[3], (1, n_hidden), n_hidden)
    w3 = u(ks[4], (n_hidden, n_hidden), n_hidden)
    b3 = u(ks[5], (1, n_hidden), n_hidden)
    w4 = u(ks[6], (n_hidden, 1), n_hidden)
    b4 = u(ks[7], (1, 1), n_hidden)
    return (w1, b1, w2, b2, w3, b3, w4, b4)


def pomelo_reference(inputs_nchw, params, compute_dtype=jnp.float32):
    """Plain-JAX reference.  Layers 1 and 4 are always f32 (matching the kernel's VPU
    path); compute_dtype mirrors the kernel's MXU operand dtype for layers 2-3."""
    w1, b1, w2, b2, w3, b3, w4, b4 = params
    cd = compute_dtype
    x = jnp.where(inputs_nchw > 1e32, 0.0, inputs_nchw)
    B, C, H, W = x.shape
    xf = jnp.transpose(x, (0, 2, 3, 1)).reshape(B * H * W, C)
    bld, data = xf[:, 0:1], xf[:, 1:]
    h = jnp.maximum(jnp.dot(data, w1, preferred_element_type=jnp.float32) + b1, 0.0)
    h = jnp.maximum(jnp.dot(h.astype(cd), w2.astype(cd),
                            preferred_element_type=jnp.float32) + b2, 0.0)
    h = jnp.maximum(jnp.dot(h.astype(cd), w3.astype(cd),
                            preferred_element_type=jnp.float32) + b3, 0.0)
    z = jnp.dot(h, w4, preferred_element_type=jnp.float32) + b4
    occ = _softplus(z)
    return jnp.sum(bld * occ).reshape(1)


if __name__ == "__main__":
    key = jax.random.PRNGKey(0)
    k_in, k_in2, k_par = jax.random.split(key, 3)

    params = init_params(k_par, cin=4, n_hidden=128)

    # --- Test 1: small 16x16 image (single spatial tile per batch element). ---
    B, C, H, W = 2, 5, 16, 16
    inputs = jax.random.uniform(k_in, (B, C, H, W), jnp.float32, 0.0, 2.0)
    # Exercise the `inputs[inputs > 1e32] = 0` masking path (data and buildings channel).
    inputs = inputs.at[0, 2, 3, 5].set(1e35)
    inputs = inputs.at[1, 0, 7, 1].set(1e35)

    out_bf16 = jax.block_until_ready(pomelo_forward(inputs, params))
    out_f32 = jax.block_until_ready(
        pomelo_forward(inputs, params, compute_dtype=jnp.float32))
    ref_f32 = pomelo_reference(inputs, params, compute_dtype=jnp.float32)
    ref_bf16 = pomelo_reference(inputs, params, compute_dtype=jnp.bfloat16)

    assert out_bf16.shape == (1,) and out_f32.shape == (1,)
    # Dtype-matched checks (real correctness of the kernel plumbing/layout).
    assert jnp.allclose(out_f32, ref_f32, rtol=1e-2, atol=1e-2), (out_f32, ref_f32)
    assert jnp.allclose(out_bf16, ref_bf16, rtol=1e-2, atol=1e-2), (out_bf16, ref_bf16)
    # Loose numerics sanity check: bf16-operand path vs the pure-f32 forward.
    assert jnp.allclose(out_bf16, ref_f32, rtol=5e-2, atol=1e-1), (out_bf16, ref_f32)

    # --- Test 2: 40x40 image with tile_hw=512 (multi-tile grid + H*W zero padding). ---
    B2, H2, W2 = 2, 40, 40
    inputs2 = jax.random.uniform(k_in2, (B2, C, H2, W2), jnp.float32, 0.0, 2.0)
    inputs2 = inputs2.at[1, 3, 11, 23].set(1e35)

    out2_f32 = jax.block_until_ready(
        pomelo_forward(inputs2, params, tile_hw=512, compute_dtype=jnp.float32))
    out2_bf16 = jax.block_until_ready(
        pomelo_forward(inputs2, params, tile_hw=512))
    ref2_f32 = pomelo_reference(inputs2, params, compute_dtype=jnp.float32)
    ref2_bf16 = pomelo_reference(inputs2, params, compute_dtype=jnp.bfloat16)

    assert jnp.allclose(out2_f32, ref2_f32, rtol=1e-2, atol=1e-2), (out2_f32, ref2_f32)
    assert jnp.allclose(out2_bf16, ref2_bf16, rtol=1e-2, atol=1e-2), (out2_bf16, ref2_bf16)

    print("KERNEL_OK")
</pallas_src>

<mosaic_0001>
module attributes {stable_mosaic.version = 11 : i64} {
  func.func @pomelo_kernel(%arg0: i32, %arg1: i32, %arg2: memref<1x5x256xf32, #tpu.memory_space<vmem>>, %arg3: memref<128x4xf32, #tpu.memory_space<vmem>>, %arg4: memref<128x1xf32, #tpu.memory_space<vmem>>, %arg5: memref<128x128xbf16, #tpu.memory_space<vmem>>, %arg6: memref<128x1xf32, #tpu.memory_space<vmem>>, %arg7: memref<128x128xbf16, #tpu.memory_space<vmem>>, %arg8: memref<128x1xf32, #tpu.memory_space<vmem>>, %arg9: memref<128x1xf32, #tpu.memory_space<vmem>>, %arg10: memref<1x1xf32, #tpu.memory_space<vmem>>, %arg11: memref<1x1x128xf32, #tpu.memory_space<vmem>>) attributes {dimension_semantics = [#tpu.dimension_semantics<parallel>, #tpu.dimension_semantics<parallel>], iteration_bounds = array<i64: 2, 1>, scalar_prefetch = 0 : i64, scratch_operands = 0 : i64, tpu.core_type = #tpu.core_type<tc>, window_params = [{transform_indices = @transform_0, window_bounds = array<i64: 1, 5, 256>}, {pipeline_mode = #tpu.pipeline_mode<synchronous>, transform_indices = @transform_1, window_bounds = array<i64: 128, 4>}, {pipeline_mode = #tpu.pipeline_mode<synchronous>, transform_indices = @transform_2, window_bounds = array<i64: 128, 1>}, {pipeline_mode = #tpu.pipeline_mode<synchronous>, transform_indices = @transform_3, window_bounds = array<i64: 128, 128>}, {pipeline_mode = #tpu.pipeline_mode<synchronous>, transform_indices = @transform_4, window_bounds = array<i64: 128, 1>}, {pipeline_mode = #tpu.pipeline_mode<synchronous>, transform_indices = @transform_5, window_bounds = array<i64: 128, 128>}, {pipeline_mode = #tpu.pipeline_mode<synchronous>, transform_indices = @transform_6, window_bounds = array<i64: 128, 1>}, {pipeline_mode = #tpu.pipeline_mode<synchronous>, transform_indices = @transform_7, window_bounds = array<i64: 128, 1>}, {pipeline_mode = #tpu.pipeline_mode<synchronous>, transform_indices = @transform_8, window_bounds = array<i64: 1, 1>}, {transform_indices = @transform_9, window_bounds = array<i64: 1, 1, 128>}]} {
    %c0 = arith.constant 0 : index
    %c0_0 = arith.constant 0 : index
    %c0_1 = arith.constant 0 : index
    %0 = vector.load %arg2[%c0, %c0_0, %c0_1] : memref<1x5x256xf32, #tpu.memory_space<vmem>>, vector<1x5x256xf32>
    %1 = vector.shape_cast %0 : vector<1x5x256xf32> to vector<5x256xf32>
    %cst = arith.constant 1.000000e+32 : f32
    %2 = vector.broadcast %cst : f32 to vector<5x256xf32>
    %3 = arith.cmpf ogt, %1, %2 : vector<5x256xf32>
    %cst_2 = arith.constant 0.000000e+00 : f32
    %4 = vector.broadcast %cst_2 : f32 to vector<5x256xf32>
    %5 = arith.select %3, %4, %1 : vector<5x256xi1>, vector<5x256xf32>
    %6 = vector.extract_strided_slice %5 {offsets = [0, 0], sizes = [1, 256], strides = [1, 1]} : vector<5x256xf32> to vector<1x256xf32>
    %c0_3 = arith.constant 0 : index
    %c0_4 = arith.constant 0 : index
    %7 = vector.load %arg3[%c0_3, %c0_4] : memref<128x4xf32, #tpu.memory_space<vmem>>, vector<128x4xf32>
    %c0_5 = arith.constant 0 : index
    %c0_6 = arith.constant 0 : index
    %8 = vector.load %arg4[%c0_5, %c0_6] : memref<128x1xf32, #tpu.memory_space<vmem>>, vector<128x1xf32>
    %9 = vector.extract_strided_slice %7 {offsets = [0, 0], sizes = [128, 1], strides = [1, 1]} : vector<128x4xf32> to vector<128x1xf32>
    %10 = vector.extract_strided_slice %5 {offsets = [1, 0], sizes = [1, 256], strides = [1, 1]} : vector<5x256xf32> to vector<1x256xf32>
    %11 = vector.broadcast %9 : vector<128x1xf32> to vector<128x256xf32>
    %12 = vector.broadcast %10 : vector<1x256xf32> to vector<128x256xf32>
    %13 = arith.mulf %11, %12 : vector<128x256xf32>
    %14 = vector.broadcast %8 : vector<128x1xf32> to vector<128x256xf32>
    %15 = arith.addf %14, %13 : vector<128x256xf32>
    %16 = vector.extract_strided_slice %7 {offsets = [0, 1], sizes = [128, 1], strides = [1, 1]} : vector<128x4xf32> to vector<128x1xf32>
    %17 = vector.extract_strided_slice %5 {offsets = [2, 0], sizes = [1, 256], strides = [1, 1]} : vector<5x256xf32> to vector<1x256xf32>
    %18 = vector.broadcast %16 : vector<128x1xf32> to vector<128x256xf32>
    %19 = vector.broadcast %17 : vector<1x256xf32> to vector<128x256xf32>
    %20 = arith.mulf %18, %19 : vector<128x256xf32>
    %21 = arith.addf %15, %20 : vector<128x256xf32>
    %22 = vector.extract_strided_slice %7 {offsets = [0, 2], sizes = [128, 1], strides = [1, 1]} : vector<128x4xf32> to vector<128x1xf32>
    %23 = vector.extract_strided_slice %5 {offsets = [3, 0], sizes = [1, 256], strides = [1, 1]} : vector<5x256xf32> to vector<1x256xf32>
    %24 = vector.broadcast %22 : vector<128x1xf32> to vector<128x256xf32>
    %25 = vector.broadcast %23 : vector<1x256xf32> to vector<128x256xf32>
    %26 = arith.mulf %24, %25 : vector<128x256xf32>
    %27 = arith.addf %21, %26 : vector<128x256xf32>
    %28 = vector.extract_strided_slice %7 {offsets = [0, 3], sizes = [128, 1], strides = [1, 1]} : vector<128x4xf32> to vector<128x1xf32>
    %29 = vector.extract_strided_slice %5 {offsets = [4, 0], sizes = [1, 256], strides = [1, 1]} : vector<5x256xf32> to vector<1x256xf32>
    %30 = vector.broadcast %28 : vector<128x1xf32> to vector<128x256xf32>
    %31 = vector.broadcast %29 : vector<1x256xf32> to vector<128x256xf32>
    %32 = arith.mulf %30, %31 : vector<128x256xf32>
    %33 = arith.addf %27, %32 : vector<128x256xf32>
    %cst_7 = arith.constant 0.000000e+00 : f32
    %34 = vector.broadcast %cst_7 : f32 to vector<128x256xf32>
    %35 = arith.maximumf %33, %34 : vector<128x256xf32>
    %c0_8 = arith.constant 0 : index
    %c0_9 = arith.constant 0 : index
    %36 = vector.load %arg5[%c0_8, %c0_9] : memref<128x128xbf16, #tpu.memory_space<vmem>>, vector<128x128xbf16>
    %37 = arith.truncf %35 : vector<128x256xf32> to vector<128x256xbf16>
    %cst_10 = arith.constant dense<0.000000e+00> : vector<128x256xf32>
    %38 = tpu.matmul %36, %37, %cst_10 {dimension_numbers = #tpu.dot_dimension_numbers<[1], [0], [0], [1], [0, 0, 1, 1], [], []>} : vector<128x128xbf16>, vector<128x256xbf16>, vector<128x256xf32> -> vector<128x256xf32>
    %c0_11 = arith.constant 0 : index
    %c0_12 = arith.constant 0 : index
    %39 = vector.load %arg6[%c0_11, %c0_12] : memref<128x1xf32, #tpu.memory_space<vmem>>, vector<128x1xf32>
    %40 = vector.broadcast %39 : vector<128x1xf32> to vector<128x256xf32>
    %41 = arith.addf %38, %40 : vector<128x256xf32>
    %cst_13 = arith.constant 0.000000e+00 : f32
    %42 = vector.broadcast %cst_13 : f32 to vector<128x256xf32>
    %43 = arith.maximumf %41, %42 : vector<128x256xf32>
    %c0_14 = arith.constant 0 : index
    %c0_15 = arith.constant 0 : index
    %44 = vector.load %arg7[%c0_14, %c0_15] : memref<128x128xbf16, #tpu.memory_space<vmem>>, vector<128x128xbf16>
    %45 = arith.truncf %43 : vector<128x256xf32> to vector<128x256xbf16>
    %cst_16 = arith.constant dense<0.000000e+00> : vector<128x256xf32>
    %46 = tpu.matmul %44, %45, %cst_16 {dimension_numbers = #tpu.dot_dimension_numbers<[1], [0], [0], [1], [0, 0, 1, 1], [], []>} : vector<128x128xbf16>, vector<128x256xbf16>, vector<128x256xf32> -> vector<128x256xf32>
    %c0_17 = arith.constant 0 : index
    %c0_18 = arith.constant 0 : index
    %47 = vector.load %arg8[%c0_17, %c0_18] : memref<128x1xf32, #tpu.memory_space<vmem>>, vector<128x1xf32>
    %48 = vector.broadcast %47 : vector<128x1xf32> to vector<128x256xf32>
    %49 = arith.addf %46, %48 : vector<128x256xf32>
    %cst_19 = arith.constant 0.000000e+00 : f32
    %50 = vector.broadcast %cst_19 : f32 to vector<128x256xf32>
    %51 = arith.maximumf %49, %50 : vector<128x256xf32>
    %c0_20 = arith.constant 0 : index
    %c0_21 = arith.constant 0 : index
    %52 = vector.load %arg9[%c0_20, %c0_21] : memref<128x1xf32, #tpu.memory_space<vmem>>, vector<128x1xf32>
    %53 = vector.broadcast %52 : vector<128x1xf32> to vector<128x256xf32>
    %54 = arith.mulf %51, %53 : vector<128x256xf32>
    %cst_22 = arith.constant dense<0.000000e+00> : vector<256xf32>
    %55 = vector.multi_reduction <add>, %54, %cst_22 [0] : vector<128x256xf32> to vector<256xf32>
    %56 = vector.shape_cast %55 : vector<256xf32> to vector<1x256xf32>
    %c0_23 = arith.constant 0 : index
    %c0_24 = arith.constant 0 : index
    %57 = vector.load %arg10[%c0_23, %c0_24] : memref<1x1xf32, #tpu.memory_space<vmem>>, vector<1x1xf32>
    %58 = vector.broadcast %57 : vector<1x1xf32> to vector<1x256xf32>
    %59 = arith.addf %56, %58 : vector<1x256xf32>
    %cst_25 = arith.constant 0.000000e+00 : f32
    %60 = vector.broadcast %cst_25 : f32 to vector<1x256xf32>
    %61 = arith.maximumf %59, %60 : vector<1x256xf32>
    %62 = math.absf %59 : vector<1x256xf32>
    %cst_26 = arith.constant 0.000000e+00 : f32
    %63 = vector.broadcast %cst_26 : f32 to vector<1x256xf32>
    %64 = arith.subf %63, %62 : vector<1x256xf32>
    %65 = math.exp %64 : vector<1x256xf32>
    %66 = math.log1p %65 : vector<1x256xf32>
    %67 = arith.addf %61, %66 : vector<1x256xf32>
    %68 = arith.mulf %6, %67 : vector<1x256xf32>
    %69 = vector.extract_strided_slice %68 {offsets = [0, 0], sizes = [1, 128], strides = [1, 1]} : vector<1x256xf32> to vector<1x128xf32>
    %70 = vector.extract_strided_slice %68 {offsets = [0, 128], sizes = [1, 128], strides = [1, 1]} : vector<1x256xf32> to vector<1x128xf32>
    %71 = arith.addf %69, %70 : vector<1x128xf32>
    %c0_27 = arith.constant 0 : index
    %c0_28 = arith.constant 0 : index
    %c0_29 = arith.constant 0 : index
    %72 = vector.load %arg11[%c0_27, %c0_28, %c0_29] : memref<1x1x128xf32, #tpu.memory_space<vmem>>, vector<1x1x128xf32>
    %73 = vector.shape_cast %72 : vector<1x1x128xf32> to vector<1x128xf32>
    %74 = vector.shape_cast %71 : vector<1x128xf32> to vector<1x1x128xf32>
    tpu.vector_store %arg11[%c0_27, %c0_28, %c0_29], %74 {strides = array<i32>} : memref<1x1x128xf32, #tpu.memory_space<vmem>>, vector<1x1x128xf32>,
    return
  }
  func.func @transform_0(%arg0: i32, %arg1: i32) -> (i32, i32, i32) {
    %c0_i32 = arith.constant 0 : i32
    %c0_i32_0 = arith.constant 0 : i32
    return %arg0, %c0_i32, %arg1 : i32, i32, i32
  }
  func.func @transform_1(%arg0: i32, %arg1: i32) -> (i32, i32) {
    %c0_i32 = arith.constant 0 : i32
    %c0_i32_0 = arith.constant 0 : i32
    %c0_i32_1 = arith.constant 0 : i32
    return %c0_i32, %c0_i32_0 : i32, i32
  }
  func.func @transform_2(%arg0: i32, %arg1: i32) -> (i32, i32) {
    %c0_i32 = arith.constant 0 : i32
    %c0_i32_0 = arith.constant 0 : i32
    %c0_i32_1 = arith.constant 0 : i32
    return %c0_i32, %c0_i32_0 : i32, i32
  }
  func.func @transform_3(%arg0: i32, %arg1: i32) -> (i32, i32) {
    %c0_i32 = arith.constant 0 : i32
    %c0_i32_0 = arith.constant 0 : i32
    %c0_i32_1 = arith.constant 0 : i32
    return %c0_i32, %c0_i32_0 : i32, i32
  }
  func.func @transform_4(%arg0: i32, %arg1: i32) -> (i32, i32) {
    %c0_i32 = arith.constant 0 : i32
    %c0_i32_0 = arith.constant 0 : i32
    %c0_i32_1 = arith.constant 0 : i32
    return %c0_i32, %c0_i32_0 : i32, i32
  }
  func.func @transform_5(%arg0: i32, %arg1: i32) -> (i32, i32) {
    %c0_i32 = arith.constant 0 : i32
    %c0_i32_0 = arith.constant 0 : i32
    %c0_i32_1 = arith.constant 0 : i32
    return %c0_i32, %c0_i32_0 : i32, i32
  }
  func.func @transform_6(%arg0: i32, %arg1: i32) -> (i32, i32) {
    %c0_i32 = arith.constant 0 : i32
    %c0_i32_0 = arith.constant 0 : i32
    %c0_i32_1 = arith.constant 0 : i32
    return %c0_i32, %c0_i32_0 : i32, i32
  }
  func.func @transform_7(%arg0: i32, %arg1: i32) -> (i32, i32) {
    %c0_i32 = arith.constant 0 : i32
    %c0_i32_0 = arith.constant 0 : i32
    %c0_i32_1 = arith.constant 0 : i32
    return %c0_i32, %c0_i32_0 : i32, i32
  }
  func.func @transform_8(%arg0: i32, %arg1: i32) -> (i32, i32) {
    %c0_i32 = arith.constant 0 : i32
    %c0_i32_0 = arith.constant 0 : i32
    %c0_i32_1 = arith.constant 0 : i32
    return %c0_i32, %c0_i32_0 : i32, i32
  }
  func.func @transform_9(%arg0: i32, %arg1: i32) -> (i32, i32, i32) {
    %c1_i32 = arith.constant 1 : i32
    %0 = arith.muli %arg0, %c1_i32 : i32
    %1 = arith.addi %0, %arg1 : i32
    %c0_i32 = arith.constant 0 : i32
    %c0_i32_0 = arith.constant 0 : i32
    %c0_i32_1 = arith.constant 0 : i32
    return %1, %c0_i32, %c0_i32_0 : i32, i32, i32
  }
}

</mosaic_0001>

<bundles_post_ra>
// kernel: tpu_custom_call.1
= control target key start
LH: loop header
LB: loop body
LE: loop exit
PB: predicated region body
PF: predicated region fallthrough
CT: control target
= control target key end

     0   :  { %s3313_s0 = inlined_call_operand.vmem [shape: f32[2,5,256], index: 0, kind: input, shape index: {}]   ;;  %s3314_s1 = inlined_call_operand.vmem [shape: f32[128,4], index: 1, kind: input, shape index: {}]   ;;  %s3315_s2 = inlined_call_operand.vmem [shape: f32[128,1], index: 2, kind: input, shape index: {}]   ;;  %s3316_s3 = inlined_call_operand.vmem [shape: bf16[128,128], index: 3, kind: input, shape index: {}]   ;;  %s3317_s4 = inlined_call_operand.vmem [shape: f32[128,1], index: 4, kind: input, shape index: {}]   ;;  %s3318_s5 = inlined_call_operand.vmem [shape: bf16[128,128], index: 5, kind: input, shape index: {}]   ;;  %s3319_s6 = inlined_call_operand.vmem [shape: f32[128,1], index: 6, kind: input, shape index: {}]   ;;  %s3320_s7 = inlined_call_operand.vmem [shape: f32[128,1], index: 7, kind: input, shape index: {}]   ;;  %s3321_s8 = inlined_call_operand.<no memory space> [shape: f32[1,1], index: 8, kind: input, shape index: {}]   ;;  %s3322_s9 = inlined_call_operand.hbm [shape: f32[2,1,128], index: 9, kind: output, shape index: {}]  }
   0x1   :  { %v14_v0 = vstv %s3321_s8 }
   0x2   :  { %15 = vst [vmem:[#allocation2] sm:$0x1] %v14_v0 }
   0x3   :  { %16 = vsyncpa [#allocation4], 0 }
   0x4   :  { %18 = vsyncpa [#allocation4 + $0x1], 0  ;;  %s2307_s11 = smov 0   ;;  %s2309_s12 = smov 0  }
   0x5   :  { %s2311_s13 = smov 0   ;;  %s2313_s14 = smov 0  }
   0x6   :  { %s2315_s15 = smov 0   ;;  %s2317_s16 = smov 0  }
   0x7 LB: > { %s2016_s8 = sadd.s32 4294967295, %s2247_s16   ;;  %s2017_s17 = sadd.s32 4294967294, %s2247_s16   ;;  %s2247_s16 = sphi %s2317_s16, %s24_s16   ;;  %s2243_s15 = sphi %s2315_s15, %s3358_s15   ;;  %s2239_s14 = sphi %s2313_s14, %s3357_s14   ;;  %s2235_s13 = sphi %s2311_s13, %s3356_s13   ;;  %s2231_s12 = sphi %s2309_s12, %s3355_s12   ;;  %s2227_s11 = sphi %s2307_s11, %s3354_s11  }
   0x8   : > { %s36_s18 = sadd.s32 1, %s2243_s15  ;;  %s241_s19 = sadd.s32 1, %s2235_s13 }
   0x9   : > { %p38_p0 = scmp.ge.s32.totalorder %s36_s18, 2  ;;  %p251_p1 = scmp.ne.s32.totalorder %s2235_s13, %s2231_s12 }
   0xa   : > { %p252_p2 = scmp.eq.s32.totalorder %s2016_s8, 1  ;;  %p257_p3 = scmp.ne.s32.totalorder %s2231_s12, %s2227_s11 }
   0xb   : > { %s3360_s18 = smov (%p38_p0, %s36_s18), 0  ;;  %p258_p5 = scmp.eq.s32.totalorder %s2017_s17, 1 }
   0xc   : > { %p2347_p4 = por %p252_p2, %p251_p1  ;;  %s238_s21 = ssub.s32 %s2243_s15, %s3360_s18 }
   0xd   : > { %p2020_p6 = scmp.ge.s32.totalorder %s2247_s16, 1  ;;  %p239_p7 = scmp.eq.s32.totalorder %s238_s21, 0 }
   0xe   : > { %p2354_p8 = por %p258_p5, %p257_p3  ;;  %p313_p9 = scmp.lt.s32.totalorder %s2247_s16, 3 }
   0xf   : > { %s2360_s23 = scalar_select %p239_p7, %s2235_s13, %s241_s19  }
  0x10   : > { %p314_p10 = pnand %p2020_p6, %p313_p9 }
  0x12   : > { %317 = sbr.rel (%p314_p10) target bundleno = 1027 (0x403), region = 56 }
  0x17   : > { %v400_v1 = vld [vmem:[%s3315_s2 + $0x70] sm:$0xff]  ;;  %v2368_v2 = vld [vmem:[%s3314_s1 + $0x60] sm:$0xff]  ;;  %v3328_v3 = vmov 2   ;;  %v3326_v4 = vmov 0   ;;  %v401_v5 = vld [vmem:[%s3315_s2 + $0x78] sm:$0xff]  ;;  %v3325_v9 = vmov 1   ;;  %v482_v0 = vlaneseq }
  0x18   : > { %2110 = vset.pattern.permute.xlu0 %v3328_v3  ;;  %2102 = vset.pattern.permute.xlu1 %v3326_v4  ;;  %v2379_v6 = vld [vmem:[%s3314_s1 + $0x40] sm:$0xff]  ;;  %v2392_v8 = vld [vmem:[%s3314_s1 + $0x78] sm:$0xff]  ;;  %v384_v10 = vld [vmem:[%s3314_s1 + $0x70] sm:$0xff]  ;;  %v3323_v17 = vmov 3   ;;  %p353_p11 = scmp.lt.s32.totalorder %s2239_s14, 1  ;;  %s350_s29 = sand.u32 1, %s2231_s12  }
  0x19   : > { %594 = vperm.xlu1 %2102, %v400_v1   ;;  %819 = vperm.xlu0 %2110, %v2368_v2   ;;  %v2387_v7 = vld [vmem:[%s3314_s1 + $0x20] sm:$0xff]  ;;  %v383_v11 = vld [vmem:[%s3314_s1 + $0x68] sm:$0xff]  ;;  %v397_v14 = vld [vmem:[%s3315_s2 + $0x58] sm:$0xff]  ;;  %s351_s10 = scalar_lea.vmem [#allocation3], %s350_s29 }
  0x1a   : > { %1282 = vmatprep.mubr.bf16.mxu0 %v3326_v4  ;;  %1603 = vmatprep.mubr.bf16.mxu1 %v3326_v4  ;;  %v398_v12 = vld [vmem:[%s3315_s2 + $0x60] sm:$0xff]  ;;  %v399_v13 = vld [vmem:[%s3315_s2 + $0x68] sm:$0xff]  ;;  %v393_v18 = vld [vmem:[%s3315_s2 + $0x38] sm:$0xff]  ;;  %s354_s24 = scalar_select %p353_p11, %s2239_s14, 1 }
  0x1b   : > { %v2422_v15 = vld [vmem:[%s3314_s1 + $0x48] sm:$0xff]  ;;  %v394_v16 = vld [vmem:[%s3315_s2 + $0x40] sm:$0xff]  ;;  %v380_v19 = vld [vmem:[%s3314_s1 + $0x50] sm:$0xff]  ;;  %s1946_s8 = sshll.u32 %s351_s10, 4  ;;  %s1947_s8 = int_to_ptr.vmem [resolvable:$true] %s1946_s8 }
  0x1c   : > { %v2440_v20 = vld [vmem:[%s3314_s1 + $0x28] sm:$0xff]  ;;  %v381_v21 = vld [vmem:[%s3314_s1 + $0x58] sm:$0xff]  ;;  %v390_v22 = vld [vmem:[%s3315_s2 + $0x20] sm:$0xff]  ;;  %s2042_s27 = sshll.u32 %s354_s24, 4  ;;  %s1933_s24 = scalar_lea.sflag [#allocation4], %s350_s29 }
  0x1d   : > { %599 = vperm.xlu1 %2102, %v401_v5   ;;  %803 = vperm.xlu0 %2110, %v2379_v6   ;;  %v389_v23 = vld [vmem:[%s3315_s2 + $0x18] sm:$0xff]  ;;  %v396_v24 = vld [vmem:[%s3315_s2 + $0x50] sm:$0xff]  ;;  %v2459_v25 = vld [vmem:[%s3314_s1 + $0x8] sm:$0xff]  ;;  %s360_s30 = scalar_lea.vmem %s3313_s0, %s2042_s27  ;;  %s2171_s25 = scalar_lea.vmem %s1947_s8, 16 }
  0x1e   : > { %v386_v26 = vld [vmem:[%s3315_s2] sm:$0xff]  ;;  %v395_v28 = vld [vmem:[%s3315_s2 + $0x48] sm:$0xff]  ;;  %v376_v29 = vld [vmem:[%s3314_s1 + $0x30] sm:$0xff]  ;;  %p2172_p12 = scmp.ne.s32.totalorder %s1947_s8, %s2171_s25 }
  0x1f   : > { %v2477_v27 = vld [vmem:[%s3314_s1] sm:$0xff]  ;;  %v377_v30 = vld [vmem:[%s3314_s1 + $0x38] sm:$0xff]  ;;  %v392_v32 = vld [vmem:[%s3315_s2 + $0x30] sm:$0xff] }
  0x20   : > { %v2503_v31 = vld [vmem:[%s3314_s1 + $0x18] sm:$0xff]  ;;  %v391_v46 = vld [vmem:[%s3315_s2 + $0x28] sm:$0xff]  ;;  %v2570_v54 = vld [vmem:[%s3314_s1 + $0x10] sm:$0xff]  ;;  %p2173_p13 = pnand %p2172_p12, %p2347_p4 }
  0x21   : > { %2103 = vset.pattern.permute.xlu1 %v3325_v9  ;;  %787 = vperm.xlu0 %2110, %v2387_v7   ;;  %v388_v61 = vld [vmem:[%s3315_s2 + $0x10] sm:$0xff]  ;;  %v365_v5 = vld [vmem:[%s360_s30 + $0x8] sm:$0x1f] }
  0x22   : > { %695 = vperm.xlu1 %2103, %v2392_v8   ;;  %vm367_vm1 = vcmp.gt.f32.partialorder %v365_v5, 1e+32  ;;  %p2174_p0 = pneg %p2173_p13 }
  0x25   : > { %2131 = vset.pattern.permute.xlu0 %v3326_v4 }
  0x26   : > { %2104 = vset.pattern.permute.xlu1 %v3326_v4  ;;  %474 = vperm.xlu0 %2131, %v384_v10  }
  0x27   : > { %464 = vperm.xlu1 %2104, %v2368_v2  }
  0x2a   : > { %479 = vperm.xlu0 %2131, %v2392_v8  }
  0x2b   : > { %2105 = vset.pattern.permute.xlu1 %v3328_v3 }
  0x2c   : > { %827 = vperm.xlu1 %2105, %v384_v10  }
  0x2e   : > { %469 = vperm.xlu0 %2131, %v383_v11  }
  0x30   : > { %831 = vperm.xlu1 %2105, %v2392_v8  }
  0x32   : > { %584 = vperm.xlu0 %2131, %v398_v12  }
  0x34   : > { %2106 = vset.pattern.permute.xlu1 %v3326_v4 }
  0x35   : > { %589 = vperm.xlu1 %2106, %v399_v13   ;;  %v2616_v13 = vsel %vm367_vm1, 0.0, %v365_v5 }
  0x36   : > { %579 = vperm.xlu0 %2131, %v397_v14   ;;  %3342 = vst [vmem:[#allocation10_spill] sm:$0xff] %v2616_v13 }
  0x39   : > { %2107 = vset.pattern.permute.xlu1 %v3325_v9 }
  0x3a   : > { %687 = vperm.xlu1 %2107, %v383_v11   ;;  %449 = vperm.xlu0 %2131, %v2422_v15  }
  0x3e   : > { %2108 = vset.pattern.permute.xlu1 %v3323_v17  ;;  %564 = vperm.xlu0 %2131, %v394_v16  }
  0x3f   : > { %963 = vperm.xlu1 %2108, %v384_v10  }
  0x42   : > { %559 = vperm.xlu0 %2131, %v393_v18  }
  0x43   : > { %2109 = vset.pattern.permute.xlu1 %v3326_v4 }
  0x44   : > { %454 = vperm.xlu1 %2109, %v380_v19  }
  0x46   : > { %429 = vperm.xlu0 %2131, %v2440_v20  }
  0x48   : > { %459 = vperm.xlu1 %2109, %v381_v21  }
  0x4a   : > { %544 = vperm.xlu0 %2131, %v390_v22  }
  0x4c   : > { %2111 = vset.pattern.permute.xlu1 %v3328_v3 }
  0x4d   : > { %823 = vperm.xlu1 %2111, %v383_v11  }
  0x4e   : > { %539 = vperm.xlu0 %2131, %v389_v23  }
  0x51   : > { %2112 = vset.pattern.permute.xlu1 %v3326_v4 }
  0x52   : > { %574 = vperm.xlu1 %2112, %v396_v24   ;;  %409 = vperm.xlu0 %2131, %v2459_v25  }
  0x56   : > { %2113 = vset.pattern.permute.xlu1 %v3325_v9  ;;  %524 = vperm.xlu0 %2131, %v386_v26  }
  0x57   : > { %675 = vperm.xlu1 %2113, %v380_v19  }
  0x5a   : > { %2138 = vset.pattern.permute.xlu0 %v3325_v9 }
  0x5b   : > { %679 = vperm.xlu1 %2113, %v381_v21   ;;  %691 = vperm.xlu0 %2138, %v384_v10  }
  0x5f   : > { %2114 = vset.pattern.permute.xlu1 %v3323_v17  ;;  %683 = vperm.xlu0 %2138, %v2368_v2  }
  0x60   : > { %959 = vperm.xlu1 %2114, %v383_v11  }
  0x63   : > { %667 = vperm.xlu0 %2138, %v2379_v6  }
  0x64   : > { %2115 = vset.pattern.permute.xlu1 %v3326_v4 }
  0x65   : > { %444 = vperm.xlu1 %2115, %v2379_v6  }
  0x67   : > { %651 = vperm.xlu0 %2138, %v2387_v7  }
  0x69   : > { %2116 = vset.pattern.permute.xlu1 %v3328_v3 }
  0x6a   : > { %811 = vperm.xlu1 %2116, %v380_v19  }
  0x6b   : > { %635 = vperm.xlu0 %2138, %v2477_v27  }
  0x6e   : > { %815 = vperm.xlu1 %2116, %v381_v21  }
  0x6f   : > { %2140 = vset.pattern.permute.xlu0 %v3323_v17 }
  0x70   : > { %967 = vperm.xlu0 %2140, %v2392_v8  }
  0x72   : > { %2117 = vset.pattern.permute.xlu1 %v3326_v4 }
  0x73   : > { %569 = vperm.xlu1 %2117, %v395_v28  }
  0x74   : > { %955 = vperm.xlu0 %2140, %v2368_v2   ;;  %v364_v2 = vld [vmem:[%s360_s30] sm:$0x1f]  ;;  %s2039_s30 = sshll.u32 %s2239_s14, 4  ;;  %s2253_s14 = smov [#allocation3]  }
  0x75   : > { %vm366_vm0 = vcmp.gt.f32.partialorder %v364_v2, 1e+32  ;;  %s1944_s21 = scalar_lea.hbm %s3322_s9, %s2039_s30  ;;  %s2175_s26 = sshll.u32 %s2253_s14, 4  ;;  %s2176_s26 = int_to_ptr.vmem [resolvable:$false] %s2175_s26 }
  0x76   : > { %v2614_v12 = vsel %vm366_vm0, 0.0, %v364_v2  ;;  %s2177_s27 = scalar_lea.vmem %s2176_s26, 32  ;;  %p2178_p1 = scmp.lt.s32.totalorder %s1947_s8, %s2176_s26 }
  0x77   : > { %2118 = vset.pattern.permute.xlu1 %v3325_v9  ;;  %3341 = vst [vmem:[#allocation9_spill] sm:$0xff] %v2614_v12  ;;  %p2179_p2 = scmp.lt.s32.totalorder %s2177_s27, %s2171_s25 }
  0x78   : > { %671 = vperm.xlu1 %2118, %v2422_v15   ;;  %951 = vperm.xlu0 %2140, %v381_v21  }
  0x79   : > { %p2180_p3 = por %p2179_p2, %p2178_p1 }
  0x7b   : > { %p2181_p5 = pnand %p2180_p3, %p2174_p0 }
  0x7c   : > { %2119 = vset.pattern.permute.xlu1 %v3323_v17  ;;  %939 = vperm.xlu0 %2140, %v2379_v6  }
  0x7d   : > { %947 = vperm.xlu1 %2119, %v380_v19  }
  0x80   : > { %935 = vperm.xlu0 %2140, %v377_v30  }
  0x81   : > { %2120 = vset.pattern.permute.xlu1 %v3326_v4 }
  0x82   : > { %434 = vperm.xlu1 %2120, %v376_v29  }
  0x84   : > { %923 = vperm.xlu0 %2140, %v2387_v7  }
  0x86   : > { %439 = vperm.xlu1 %2120, %v377_v30  }
  0x88   : > { %919 = vperm.xlu0 %2140, %v2503_v31  }
  0x8a   : > { %2121 = vset.pattern.permute.xlu1 %v3328_v3 }
  0x8b   : > { %807 = vperm.xlu1 %2121, %v2422_v15  }
  0x8c   : > { %907 = vperm.xlu0 %2140, %v2477_v27  }
  0x8f   : > { %2122 = vset.pattern.permute.xlu1 %v3326_v4 }
  0x90   : > { %554 = vperm.xlu1 %2122, %v392_v32   ;;  %2145 = vset.pattern.permute.xlu0 %v3326_v4 }
  0x94   : > { %v2514_v33 = vpop.permute.xlu1 %594  ;;  %2123 = vset.pattern.permute.xlu1 %v3325_v9  ;;  %v2517_v34 = vpop.permute.xlu0 %819 }
  0x95   : > { %659 = vperm.xlu1 %2123, %v376_v29  }
  0x98   : > { %v2519_v35 = vpop.permute.xlu1 %599  ;;  %v2521_v36 = vpop.permute.xlu0 %803 }
  0x99   : > { %663 = vperm.xlu1 %2123, %v377_v30  }
  0x9c   : > { %v2523_v37 = vpop.permute.xlu0 %787 }
  0x9d   : > { %v2525_v38 = vpop.permute.xlu1 %695  ;;  %2124 = vset.pattern.permute.xlu1 %v3323_v17 }
  0x9e   : > { %943 = vperm.xlu1 %2124, %v2422_v15  }
  0xa1   : > { %v2529_v39 = vpop.permute.xlu0 %474 }
  0xa2   : > { %v2531_v40 = vpop.permute.xlu1 %464  ;;  %2125 = vset.pattern.permute.xlu1 %v3326_v4 }
  0xa3   : > { %424 = vperm.xlu1 %2125, %v2387_v7   ;;  %v2607_v7 = vshrl.u32 %v482_v0, 7 }
  0xa5   : > { %v2535_v41 = vpop.permute.xlu0 %479  ;;  %3340 = vst [vmem:[#allocation8_spill] sm:$0xff] %v2607_v7  ;;  %v484_v8 = vsub.s32 1, %v2607_v7  ;;  %v700_v14 = vsub.s32 2, %v2607_v7  ;;  %v836_v18 = vsub.s32 3, %v2607_v7  ;;  %v972_v19 = vsub.s32 4, %v2607_v7 }
  0xa7   : > { %v2537_v42 = vpop.permute.xlu1 %827  ;;  %2126 = vset.pattern.permute.xlu1 %v3328_v3  ;;  %v2620_v15 = vrot.slane %v2614_v12, %v484_v8  ;;  %v2623_v16 = vrot.slane %v2616_v13, %v484_v8  ;;  %v2633_v24 = vrot.slane %v2614_v12, %v700_v14  ;;  %v2639_v28 = vrot.slane %v2616_v13, %v700_v14 }
  0xa8   : > { %795 = vperm.xlu1 %2126, %v376_v29   ;;  %v2646_v32 = vrot.slane %v2614_v12, %v836_v18  ;;  %v2658_v0 = vrot.slane %v2616_v13, %v972_v19 }
  0xa9   : > { %v2540_v43 = vpop.permute.xlu0 %469  ;;  %v520_v22 = vmul.f32 %v2620_v15, %v2535_v41  ;;  %v521_v26 = vmul.f32 %v2623_v16, %v2535_v41  ;;  %v736_v14 = vmul.f32 %v2633_v24, %v2525_v38 }
  0xaa   : > { %v2664_v5 = vmul.f32 %v2646_v32, %v2517_v34 }
  0xab   : > { %v2542_v44 = vpop.permute.xlu1 %831 }
  0xac   : > { %799 = vperm.xlu1 %2126, %v377_v30   ;;  %v519_v30 = vmul.f32 %v2623_v16, %v2529_v39 }
  0xad   : > { %v2544_v45 = vpop.permute.xlu0 %584 }
  0xb0   : > { %v2549_v47 = vpop.permute.xlu1 %589  ;;  %2127 = vset.pattern.permute.xlu1 %v3326_v4 }
  0xb1   : > { %549 = vperm.xlu1 %2127, %v391_v46   ;;  %v2552_v48 = vpop.permute.xlu0 %579  ;;  %v2649_v46 = vrot.slane %v2616_v13, %v836_v18  ;;  %v633_v18 = vadd.f32 %v2519_v35, %v521_v26  ;;  %v517_v26 = vmul.f32 %v2623_v16, %v2540_v43 }
  0xb3   : > { %v2668_v8 = vmul.f32 %v2649_v46, %v2517_v34  ;;  %v872_v34 = vmul.f32 %v2646_v32, %v2542_v44 }
  0xb5   : > { %v2554_v49 = vpop.permute.xlu1 %687  ;;  %2128 = vset.pattern.permute.xlu1 %v3325_v9  ;;  %v2557_v50 = vpop.permute.xlu0 %449 }
  0xb6   : > { %655 = vperm.xlu1 %2128, %v2440_v20   ;;  %v732_v7 = vmul.f32 %v2633_v24, %v2554_v49 }
  0xb9   : > { %v2560_v51 = vpop.permute.xlu0 %564 }
  0xba   : > { %v2562_v52 = vpop.permute.xlu1 %963  ;;  %2129 = vset.pattern.permute.xlu1 %v3323_v17 }
  0xbb   : > { %931 = vperm.xlu1 %2129, %v376_v29   ;;  %v518_v29 = vmul.f32 %v2620_v15, %v2529_v39 }
  0xbd   : > { %v2565_v53 = vpop.permute.xlu0 %559 }
  0xbf   : > { %v2572_v55 = vpop.permute.xlu1 %454  ;;  %2130 = vset.pattern.permute.xlu1 %v3326_v4 }
  0xc0   : > { %414 = vperm.xlu1 %2130, %v2570_v54  }
  0xc1   : > { %v2576_v56 = vpop.permute.xlu0 %429 }
  0xc3   : > { %v2578_v57 = vpop.permute.xlu1 %459 }
  0xc4   : > { %419 = vperm.xlu1 %2130, %v2503_v31  }
  0xc5   : > { %v2582_v58 = vpop.permute.xlu0 %544 }
  0xc8   : > { %v2585_v59 = vpop.permute.xlu1 %823  ;;  %2132 = vset.pattern.permute.xlu1 %v3328_v3 }
  0xc9   : > { %791 = vperm.xlu1 %2132, %v2440_v20   ;;  %v2589_v60 = vpop.permute.xlu0 %539 }
  0xcd   : > { %v2594_v62 = vpop.permute.xlu1 %574  ;;  %2133 = vset.pattern.permute.xlu1 %v3326_v4  ;;  %v2597_v63 = vpop.permute.xlu0 %409 }
  0xce   : > { %3338 = vst [vmem:[#allocation6_spill] sm:$0xff] %v2597_v63  ;;  %534 = vperm.xlu1 %2133, %v388_v61   ;;  %v2652_v61 = vrot.slane %v2614_v12, %v972_v19  ;;  %v630_v19 = vadd.f32 %v2514_v33, %v518_v29  ;;  %v870_v12 = vmul.f32 %v2646_v32, %v2537_v42 }
  0xd1   : > { %v2602_v1 = vpop.permute.xlu0 %524 }
  0xd2   : > { %3339 = vst [vmem:[#allocation7_spill] sm:$0xff] %v2602_v1  ;;  %v2604_v6 = vpop.permute.xlu1 %675  ;;  %2134 = vset.pattern.permute.xlu1 %v3325_v9  ;;  %v514_v9 = vmul.f32 %v2620_v15, %v2531_v40 }
  0xd3   : > { %643 = vperm.xlu1 %2134, %v2570_v54  }
  0xd4   : > { %v626_v1 = vadd.f32 %v2544_v45, %v514_v9 }
  0xd6   : > { %v2611_v10 = vpop.permute.xlu1 %679  ;;  %v692_v11 = vpop.permute.xlu0 %691 }
  0xd7   : > { %647 = vperm.xlu1 %2134, %v2503_v31   ;;  %v734_v2 = vmul.f32 %v2633_v24, %v692_v11  ;;  %v735_v39 = vmul.f32 %v2639_v28, %v692_v11  ;;  %v737_v11 = vmul.f32 %v2639_v28, %v2525_v38  ;;  %v873_v38 = vmul.f32 %v2649_v46, %v2542_v44 }
  0xd8   : > { %v871_v44 = vmul.f32 %v2649_v46, %v2537_v42 }
  0xd9   : > { %v769_v13 = vadd.f32 %v737_v11, %v633_v18 }
  0xda   : > { %v684_v21 = vpop.permute.xlu0 %683 }
  0xdb   : > { %v2629_v23 = vpop.permute.xlu1 %959  ;;  %2135 = vset.pattern.permute.xlu1 %v3323_v17  ;;  %v631_v17 = vadd.f32 %v2514_v33, %v519_v30  ;;  %v515_v33 = vmul.f32 %v2623_v16, %v2531_v40  ;;  %v905_v42 = vadd.f32 %v873_v38, %v769_v13  ;;  %v730_v9 = vmul.f32 %v2633_v24, %v684_v21 }
  0xdc   : > { %927 = vperm.xlu1 %2135, %v2440_v20   ;;  %v632_v20 = vadd.f32 %v2519_v35, %v520_v22  ;;  %v516_v35 = vmul.f32 %v2620_v15, %v2540_v43  ;;  %v733_v43 = vmul.f32 %v2639_v28, %v2554_v49  ;;  %v1007_v13 = vmul.f32 %v2658_v0, %v2562_v52 }
  0xdd   : > { %v767_v3 = vadd.f32 %v735_v39, %v631_v17  ;;  %v627_v40 = vadd.f32 %v2544_v45, %v515_v33  ;;  %v3343_v17 = vmov 2   ;;  %v629_v39 = vadd.f32 %v2549_v47, %v517_v26 }
  0xde   : > { %v2654_v41 = vpop.permute.xlu0 %667  ;;  %v768_v30 = vadd.f32 %v736_v14, %v632_v20  ;;  %v512_v14 = vmul.f32 %v2620_v15, %v2578_v57  ;;  %v731_v45 = vmul.f32 %v2639_v28, %v684_v21  ;;  %v1006_v26 = vmul.f32 %v2652_v61, %v2562_v52 }
  0xdf   : > { %v903_v11 = vadd.f32 %v871_v44, %v767_v3  ;;  %v513_v3 = vmul.f32 %v2623_v16, %v2578_v57  ;;  %v1005_v38 = vmul.f32 %v2658_v0, %v2629_v23  ;;  %v762_v52 = vadd.f32 %v730_v9, %v626_v1 }
  0xe0   : > { %v2673_v22 = vpop.permute.xlu1 %444  ;;  %2136 = vset.pattern.permute.xlu1 %v3326_v4  ;;  %v766_v4 = vadd.f32 %v734_v2, %v630_v19  ;;  %v904_v63 = vadd.f32 %v872_v34, %v768_v30  ;;  %v628_v2 = vadd.f32 %v2549_v47, %v516_v35  ;;  %v765_v34 = vadd.f32 %v733_v43, %v629_v39 }
  0xe1   : > { %404 = vperm.xlu1 %2136, %v2477_v27   ;;  %v868_v35 = vmul.f32 %v2646_v32, %v2585_v59  ;;  %v869_v47 = vmul.f32 %v2649_v46, %v2585_v59  ;;  %v624_v21 = vadd.f32 %v2552_v48, %v512_v14  ;;  %v1004_v59 = vmul.f32 %v2652_v61, %v2629_v23  ;;  %v387_v14 = vld [vmem:[%s3315_s2 + $0x8] sm:$0xff] }
  0xe2   : > { %v2691_v29 = vpop.permute.xlu0 %651  ;;  %v902_v18 = vadd.f32 %v870_v12, %v766_v4  ;;  %v764_v19 = vadd.f32 %v732_v7, %v628_v2  ;;  %v510_v4 = vmul.f32 %v2620_v15, %v2572_v55  ;;  %v511_v12 = vmul.f32 %v2623_v16, %v2572_v55 }
  0xe3   : > { %v763_v33 = vadd.f32 %v731_v45, %v627_v40  ;;  %v1039_v43 = vadd.f32 %v1007_v13, %v903_v11  ;;  %v901_v2 = vadd.f32 %v869_v47, %v765_v34  ;;  %v728_v1 = vmul.f32 %v2633_v24, %v2611_v10 }
  0xe4   : > { %v1038_v44 = vadd.f32 %v1006_v26, %v902_v18  ;;  %v900_v57 = vadd.f32 %v868_v35, %v764_v19  ;;  %v622_v23 = vadd.f32 %v2594_v62, %v510_v4  ;;  %v3345_v11 = vmov 0  }
  0xe5   : > { %v2705_v20 = vpop.permute.xlu1 %811  ;;  %2137 = vset.pattern.permute.xlu1 %v3343_v17  ;;  %v1037_v18 = vadd.f32 %v1005_v38, %v901_v2  ;;  %v898_v35 = vadd.f32 %v2664_v5, %v762_v52  ;;  %v1071_v47 = vmax.f32 %v1039_v43, 0.0  ;;  %v729_v5 = vmul.f32 %v2639_v28, %v2611_v10 }
  0xe6   : > { %779 = vperm.xlu1 %2137, %v2570_v54   ;;  %v2713_v49 = vpop.permute.xlu0 %635  ;;  %v1036_v40 = vadd.f32 %v1004_v59, %v900_v57  ;;  %v1070_v26 = vmax.f32 %v1038_v44, 0.0  ;;  %v3346_v57 = vmov 1   ;;  %v863_v10 = vmul.f32 %v2649_v46, %v2705_v20 }
  0xe7   : > { %3344 = vst [vmem:[#allocation11_spill] sm:$0xff] %v2713_v49  ;;  %v625_v49 = vadd.f32 %v2552_v48, %v513_v3  ;;  %v899_v48 = vadd.f32 %v2668_v8, %v763_v33  ;;  %v760_v33 = vadd.f32 %v728_v1, %v624_v21  ;;  %v1069_v2 = vmax.f32 %v1037_v18, 0.0 }
  0xe9   : > { %v816_v7 = vpop.permute.xlu1 %815 }
  0xea   : > { %783 = vperm.xlu1 %2137, %v2503_v31   ;;  %v623_v31 = vadd.f32 %v2594_v62, %v511_v12  ;;  %v864_v8 = vmul.f32 %v2646_v32, %v816_v7 }
  0xeb   : > { %v968_v30 = vpop.permute.xlu0 %967 }
  0xec   : > { %v1008_v39 = vmul.f32 %v2652_v61, %v968_v30  ;;  %v1009_v55 = vmul.f32 %v2658_v0, %v968_v30  ;;  %v865_v30 = vmul.f32 %v2649_v46, %v816_v7  ;;  %v761_v7 = vadd.f32 %v729_v5, %v625_v49 }
  0xee   : > { %v1040_v9 = vadd.f32 %v1008_v39, %v904_v63  ;;  %v2747_v45 = vpop.permute.xlu1 %569  ;;  %2139 = vset.pattern.permute.xlu1 %v3345_v11  ;;  %v1041_v19 = vadd.f32 %v1009_v55, %v905_v42  ;;  %v726_v63 = vmul.f32 %v2633_v24, %v2604_v6  ;;  %v727_v42 = vmul.f32 %v2639_v28, %v2604_v6 }
  0xef   : > { %v956_v34 = vpop.permute.xlu0 %955  ;;  %529 = vperm.xlu1 %2139, %v387_v14   ;;  %v1068_v39 = vmax.f32 %v1036_v40, 0.0  ;;  %v862_v6 = vmul.f32 %v2646_v32, %v2705_v20  ;;  %v896_v40 = vadd.f32 %v864_v8, %v760_v33 }
  0xf0   : > { %v1002_v62 = vmul.f32 %v2652_v61, %v956_v34  ;;  %v1003_v13 = vmul.f32 %v2658_v0, %v956_v34  ;;  %v1073_v4 = vmax.f32 %v1041_v19, 0.0  ;;  %v1072_v3 = vmax.f32 %v1040_v9, 0.0 }
  0xf1   : > { %v758_v21 = vadd.f32 %v726_v63, %v622_v23  ;;  %v759_v18 = vadd.f32 %v727_v42, %v623_v31 }
  0xf2   : > { %v1034_v12 = vadd.f32 %v1002_v62, %v898_v35  ;;  %v1035_v59 = vadd.f32 %v1003_v13, %v899_v48  ;;  %v1105_v38 = vpack.c.bf16 %v1073_v4, %v1071_v47  ;;  %v1104_v52 = vpack.c.bf16 %v1072_v3, %v1070_v26 }
  0xf3   : > { %v2762_v43 = vpop.permute.xlu1 %671  ;;  %v952_v44 = vpop.permute.xlu0 %951  ;;  %2141 = vset.pattern.permute.xlu1 %v3346_v57  ;;  %v897_v35 = vadd.f32 %v865_v30, %v761_v7  ;;  %v894_v48 = vadd.f32 %v862_v6, %v758_v21  ;;  %v895_v47 = vadd.f32 %v863_v10, %v759_v18  ;;  %v3347_v62 = vmov 3  }
  0xf4   : > { %v1066_v55 = vmax.f32 %v1034_v12, 0.0  ;;  %v1067_v14 = vmax.f32 %v1035_v59, 0.0  ;;  %639 = vperm.xlu1 %2141, %v2459_v25   ;;  %1250 = vmatprep.subr.bf16.mxu0 %v1105_v38  ;;  %v1000_v1 = vmul.f32 %v2652_v61, %v952_v44  ;;  %v1001_v9 = vmul.f32 %v2658_v0, %v952_v44 }
  0xf5   : > { %1251 = vmatpush1.bf16.msra.mxu0 %v1104_v52  ;;  %v506_v52 = vmul.f32 %v2620_v15, %v2673_v22  ;;  %v723_v30 = vmul.f32 %v2639_v28, %v2654_v41  ;;  %v858_v6 = vmul.f32 %v2646_v32, %v2521_v36  ;;  %v859_v10 = vmul.f32 %v2649_v46, %v2521_v36 }
  0xf6   : > { %v1103_v19 = vpack.c.bf16 %v1069_v2, %v1067_v14  ;;  %v1102_v34 = vpack.c.bf16 %v1068_v39, %v1066_v55  ;;  %v1032_v20 = vadd.f32 %v1000_v1, %v896_v40  ;;  %v1033_v13 = vadd.f32 %v1001_v9, %v897_v35 }
  0xf7   : > { %v618_v44 = vadd.f32 %v2560_v51, %v506_v52  ;;  %v508_v2 = vmul.f32 %v2620_v15, %v2557_v50  ;;  %v940_v39 = vpop.permute.xlu0 %939  ;;  %v724_v14 = vmul.f32 %v2633_v24, %v2762_v43 }
  0xf8   : > { %v948_v26 = vpop.permute.xlu1 %947  ;;  %2142 = vset.pattern.permute.xlu1 %v3347_v62  ;;  %1252 = vmatprep.subr.bf16.mxu0 %v1103_v19  ;;  %v1064_v3 = vmax.f32 %v1032_v20, 0.0  ;;  %v1065_v63 = vmax.f32 %v1033_v13, 0.0  ;;  %v994_v7 = vmul.f32 %v2652_v61, %v940_v39 }
  0xf9   : > { %v998_v49 = vmul.f32 %v2652_v61, %v948_v26  ;;  %v999_v23 = vmul.f32 %v2658_v0, %v948_v26  ;;  %915 = vperm.xlu1 %2142, %v2570_v54   ;;  %1253 = vmatpush1.bf16.msra.mxu0 %v1102_v34  ;;  %v620_v1 = vadd.f32 %v2747_v45, %v508_v2 }
  0xfb   : > { %v1030_v31 = vadd.f32 %v998_v49, %v894_v48  ;;  %v1031_v4 = vadd.f32 %v999_v23, %v895_v47  ;;  %v756_v34 = vadd.f32 %v724_v14, %v620_v1  ;;  %v936_v1 = vpop.permute.xlu0 %935 }
  0xfd   : > { %v2776_v42 = vpop.permute.xlu1 %434  ;;  %2143 = vset.pattern.permute.xlu1 %v3343_v17  ;;  %v1063_v5 = vmax.f32 %v1031_v4, 0.0  ;;  %v1062_v8 = vmax.f32 %v1030_v31, 0.0  ;;  %v507_v17 = vmul.f32 %v2623_v16, %v2673_v22  ;;  %v509_v22 = vmul.f32 %v2623_v16, %v2557_v50 }
  0xfe   : > { %771 = vperm.xlu1 %2143, %v2477_v27   ;;  %v722_v27 = vmul.f32 %v2633_v24, %v2654_v41  ;;  %v995_v50 = vmul.f32 %v2658_v0, %v940_v39 }
  0xff   : > { %v1101_v12 = vpack.c.bf16 %v1065_v63, %v1063_v5  ;;  %v1100_v59 = vpack.c.bf16 %v1064_v3, %v1062_v8  ;;  %v621_v9 = vadd.f32 %v2747_v45, %v509_v22 }
 0x100   : > { %v754_v55 = vadd.f32 %v722_v27, %v618_v44  ;;  %v502_v44 = vmul.f32 %v2620_v15, %v2776_v42 }
 0x101   : > { %v440_v38 = vpop.permute.xlu1 %439  ;;  %1254 = vmatprep.subr.bf16.mxu0 %v1101_v12 }
 0x102   : > { %775 = vperm.xlu1 %2143, %v2459_v25   ;;  %1255 = vmatpush1.bf16.msra.mxu0 %v1100_v59  ;;  %v890_v40 = vadd.f32 %v858_v6, %v754_v55  ;;  %v505_v52 = vmul.f32 %v2623_v16, %v440_v38  ;;  %v1120_v6 = vld [vmem:[%s3317_s4 + $0x70] sm:$0xff] }
 0x103   : > { %1194 = vperm.xlu0 %2145, %v1120_v6   ;;  %v1108_v6 = vld [vmem:[%s3317_s4 + $0x10] sm:$0xff] }
 0x104   : > { %v1026_v48 = vadd.f32 %v994_v7, %v890_v40  ;;  %v617_v2 = vadd.f32 %v2565_v53, %v505_v52 }
 0x106   : > { %v808_v54 = vpop.permute.xlu1 %807  ;;  %2144 = vset.pattern.permute.xlu1 %v3347_v62  ;;  %v1058_v45 = vmax.f32 %v1026_v48, 0.0 }
 0x107   : > { %911 = vperm.xlu1 %2144, %v2459_v25   ;;  %v619_v25 = vadd.f32 %v2560_v51, %v507_v17  ;;  %v725_v51 = vmul.f32 %v2639_v28, %v2762_v43  ;;  %v860_v18 = vmul.f32 %v2646_v32, %v808_v54  ;;  %v861_v36 = vmul.f32 %v2649_v46, %v808_v54 }
 0x108   : > { %v504_v54 = vmul.f32 %v2620_v15, %v440_v38  ;;  %v1121_v38 = vld [vmem:[%s3317_s4 + $0x78] sm:$0xff] }
 0x109   : > { %v755_v41 = vadd.f32 %v723_v30, %v619_v25  ;;  %v757_v35 = vadd.f32 %v725_v51, %v621_v9  ;;  %v892_v20 = vadd.f32 %v860_v18, %v756_v34  ;;  %v993_v18 = vmul.f32 %v2658_v0, %v936_v1 }
 0x10a   : > { %v616_v25 = vadd.f32 %v2565_v53, %v504_v54 }
 0x10b   : > { %v2787_v33 = vpop.permute.xlu1 %554  ;;  %2146 = vset.pattern.permute.xlu1 %v3345_v11  ;;  %v891_v19 = vadd.f32 %v859_v10, %v755_v41  ;;  %v893_v26 = vadd.f32 %v861_v36, %v757_v35  ;;  %v503_v10 = vmul.f32 %v2623_v16, %v2776_v42 }
 0x10c   : > { %1199 = vperm.xlu1 %2146, %v1121_v38   ;;  %v614_v7 = vadd.f32 %v2787_v33, %v502_v44  ;;  %v1113_v44 = vld [vmem:[%s3317_s4 + $0x38] sm:$0xff]  ;;  %v1111_v38 = vld [vmem:[%s3317_s4 + $0x28] sm:$0xff] }
 0x10d   : > { %v1027_v47 = vadd.f32 %v995_v50, %v891_v19  ;;  %v615_v50 = vadd.f32 %v2787_v33, %v503_v10 }
 0x10f   : > { %v1059_v31 = vmax.f32 %v1027_v47, 0.0 }
 0x110   : > { %v660_v57 = vpop.permute.xlu1 %659 }
 0x111   : > { %v718_v55 = vmul.f32 %v2633_v24, %v660_v57  ;;  %v719_v41 = vmul.f32 %v2639_v28, %v660_v57  ;;  %v992_v57 = vmul.f32 %v2652_v61, %v936_v1  ;;  %v1427_v1 = vld [vmem:[%s3319_s6] sm:$0xff] }
 0x113   : > { %v750_v19 = vadd.f32 %v718_v55, %v614_v7  ;;  %v751_v34 = vadd.f32 %v719_v41, %v615_v50  ;;  %v1109_v55 = vld [vmem:[%s3317_s4 + $0x18] sm:$0xff]  ;;  %v714_v41 = vmul.f32 %v2633_v24, %v2691_v29  ;;  %v1107_v7 = vld [vmem:[%s3317_s4 + $0x8] sm:$0xff] }
 0x114   : > { %v664_v21 = vpop.permute.xlu1 %663 }
 0x115   : > { %v720_v27 = vmul.f32 %v2633_v24, %v664_v21  ;;  %v721_v30 = vmul.f32 %v2639_v28, %v664_v21  ;;  %v1118_v21 = vld [vmem:[%s3317_s4 + $0x60] sm:$0xff] }
 0x116   : > { %1184 = vperm.xlu1 %2146, %v1118_v21  }
 0x117   : > { %v752_v53 = vadd.f32 %v720_v27, %v616_v25  ;;  %v753_v14 = vadd.f32 %v721_v30, %v617_v2  ;;  %v1115_v27 = vld [vmem:[%s3317_s4 + $0x48] sm:$0xff]  ;;  %v1112_v30 = vld [vmem:[%s3317_s4 + $0x30] sm:$0xff]  ;;  %v1110_v25 = vld [vmem:[%s3317_s4 + $0x20] sm:$0xff] }
 0x119   : > { %v944_v43 = vpop.permute.xlu1 %943 }
 0x11a   : > { %v996_v62 = vmul.f32 %v2652_v61, %v944_v43  ;;  %v997_v13 = vmul.f32 %v2658_v0, %v944_v43 }
 0x11c   : > { %v1028_v49 = vadd.f32 %v996_v62, %v892_v20  ;;  %v1029_v23 = vadd.f32 %v997_v13, %v893_v26  ;;  %v1119_v62 = vld [vmem:[%s3317_s4 + $0x68] sm:$0xff]  ;;  %v1116_v13 = vld [vmem:[%s3317_s4 + $0x50] sm:$0xff] }
 0x11d   : > { %1189 = vperm.xlu0 %2145, %v1119_v62   ;;  %1174 = vperm.xlu1 %2146, %v1116_v13  }
 0x11e   : > { %v1060_v4 = vmax.f32 %v1028_v49, 0.0  ;;  %v1061_v3 = vmax.f32 %v1029_v23, 0.0  ;;  %v2816_v63 = vpop.permute.xlu1 %424 }
 0x120   : > { %v1099_v5 = vpack.c.bf16 %v1061_v3, %v1059_v31  ;;  %v1098_v8 = vpack.c.bf16 %v1060_v4, %v1058_v45  ;;  %v1117_v45 = vld [vmem:[%s3317_s4 + $0x58] sm:$0xff]  ;;  %v1114_v31 = vld [vmem:[%s3317_s4 + $0x40] sm:$0xff] }
 0x121   : > { %1179 = vperm.xlu0 %2145, %v1117_v45   ;;  %1164 = vperm.xlu1 %2146, %v1114_v31  }
 0x122   : > { %1256 = vmatprep.subr.bf16.mxu0 %v1099_v5 }
 0x123   : > { %v796_v12 = vpop.permute.xlu1 %795  ;;  %1257 = vmatpush1.bf16.msra.mxu0 %v1098_v8 }
 0x124   : > { %v854_v42 = vmul.f32 %v2646_v32, %v796_v12  ;;  %v855_v9 = vmul.f32 %v2649_v46, %v796_v12 }
 0x125   : > { %1169 = vperm.xlu0 %2145, %v1115_v27   ;;  %1154 = vperm.xlu1 %2146, %v1112_v30   ;;  %v1431_v30 = vld [vmem:[%s3319_s6 + $0x20] sm:$0xff] }
 0x126   : > { %v886_v35 = vadd.f32 %v854_v42, %v750_v19  ;;  %v887_v48 = vadd.f32 %v855_v9, %v751_v34 }
 0x127   : > { %v800_v59 = vpop.permute.xlu1 %799 }
 0x128   : > { %v856_v22 = vmul.f32 %v2646_v32, %v800_v59  ;;  %v857_v39 = vmul.f32 %v2649_v46, %v800_v59 }
 0x129   : > { %1159 = vperm.xlu0 %2145, %v1113_v44   ;;  %1144 = vperm.xlu1 %2146, %v1110_v25  }
 0x12a   : > { %v888_v36 = vadd.f32 %v856_v22, %v752_v53  ;;  %v889_v40 = vadd.f32 %v857_v39, %v753_v14  ;;  %v498_v22 = vmul.f32 %v2620_v15, %v2816_v63  ;;  %v499_v39 = vmul.f32 %v2623_v16, %v2816_v63  ;;  %v1106_v63 = vld [vmem:[%s3317_s4] sm:$0xff] }
 0x12b   : > { %v715_v53 = vmul.f32 %v2639_v28, %v2691_v29  ;;  %v850_v29 = vmul.f32 %v2646_v32, %v2523_v37 }
 0x12c   : > { %v2820_v17 = vpop.permute.xlu1 %549  ;;  %v1024_v43 = vadd.f32 %v992_v57, %v888_v36  ;;  %v1025_v20 = vadd.f32 %v993_v18, %v889_v40  ;;  %v610_v14 = vadd.f32 %v2582_v58, %v498_v22  ;;  %v611_v21 = vadd.f32 %v2582_v58, %v499_v39  ;;  %v924_v57 = vpop.permute.xlu0 %923  ;;  %v1428_v18 = vld [vmem:[%s3319_s6 + $0x8] sm:$0xff] }
 0x12d   : > { %1149 = vperm.xlu0 %2145, %v1111_v38   ;;  %1134 = vperm.xlu1 %2146, %v1108_v6   ;;  %v851_v58 = vmul.f32 %v2649_v46, %v2523_v37  ;;  %v500_v36 = vmul.f32 %v2620_v15, %v2576_v56  ;;  %v501_v40 = vmul.f32 %v2623_v16, %v2576_v56  ;;  %v1429_v37 = vld [vmem:[%s3319_s6 + $0x10] sm:$0xff] }
 0x12e   : > { %v1057_v8 = vmax.f32 %v1025_v20, 0.0  ;;  %v1056_v12 = vmax.f32 %v1024_v43, 0.0  ;;  %v746_v42 = vadd.f32 %v714_v41, %v610_v14  ;;  %v747_v9 = vadd.f32 %v715_v53, %v611_v21  ;;  %v1718_v38 = vld [vmem:[%s3320_s7 + $0x10] sm:$0xff]  ;;  %v1719_v53 = vld [vmem:[%s3320_s7 + $0x18] sm:$0xff] }
 0x12f   : > { %v986_v43 = vmul.f32 %v2652_v61, %v924_v57  ;;  %v987_v20 = vmul.f32 %v2658_v0, %v924_v57  ;;  %v613_v56 = vadd.f32 %v2820_v17, %v501_v40  ;;  %v1433_v14 = vld [vmem:[%s3319_s6 + $0x30] sm:$0xff]  ;;  %v1721_v57 = vld [vmem:[%s3320_s7 + $0x28] sm:$0xff] }
 0x131   : > { %v2840_v51 = vpop.permute.xlu1 %655  ;;  %1139 = vperm.xlu0 %2145, %v1109_v55   ;;  %1124 = vperm.xlu1 %2146, %v1106_v63   ;;  %v1432_v63 = vld [vmem:[%s3319_s6 + $0x28] sm:$0xff] }
 0x132   : > { %v716_v19 = vmul.f32 %v2633_v24, %v2840_v51  ;;  %v717_v34 = vmul.f32 %v2639_v28, %v2840_v51  ;;  %v1430_v51 = vld [vmem:[%s3319_s6 + $0x18] sm:$0xff] }
 0x135   : > { %1129 = vperm.xlu0 %2145, %v1107_v7   ;;  %1445 = vperm.xlu1 %2146, %v1427_v1   ;;  %v1720_v7 = vld [vmem:[%s3320_s7 + $0x20] sm:$0xff]  ;;  %v1434_v1 = vld [vmem:[%s3319_s6 + $0x38] sm:$0xff] }
 0x136   : > { %v932_v47 = vpop.permute.xlu1 %931 }
 0x137   : > { %v990_v33 = vmul.f32 %v2652_v61, %v932_v47  ;;  %v991_v26 = vmul.f32 %v2658_v0, %v932_v47  ;;  %v883_v47 = vadd.f32 %v851_v58, %v747_v9  ;;  %v1435_v58 = vld [vmem:[%s3319_s6 + $0x40] sm:$0xff] }
 0x139   : > { %v1022_v49 = vadd.f32 %v990_v33, %v886_v35  ;;  %v1023_v23 = vadd.f32 %v991_v26, %v887_v48  ;;  %v882_v48 = vadd.f32 %v850_v29, %v746_v42  ;;  %v612_v33 = vadd.f32 %v2820_v17, %v500_v36  ;;  %1450 = vperm.xlu0 %2145, %v1428_v18  }
 0x13a   : > { %1455 = vperm.xlu1 %2146, %v1429_v37   ;;  %v1019_v31 = vadd.f32 %v987_v20, %v883_v47  ;;  %v1722_v37 = vld [vmem:[%s3320_s7 + $0x30] sm:$0xff] }
 0x13b   : > { %v1054_v4 = vmax.f32 %v1022_v49, 0.0  ;;  %v1055_v3 = vmax.f32 %v1023_v23, 0.0  ;;  %v2865_v5 = vpop.permute.xlu1 %414  ;;  %v748_v13 = vadd.f32 %v716_v19, %v612_v33  ;;  %v749_v49 = vadd.f32 %v717_v34, %v613_v56  ;;  %v1716_v23 = vld [vmem:[%s3320_s7] sm:$0xff] }
 0x13c   : > { %v1018_v45 = vadd.f32 %v986_v43, %v882_v48  ;;  %v1051_v25 = vmax.f32 %v1019_v31, 0.0  ;;  %v494_v48 = vmul.f32 %v2620_v15, %v2865_v5  ;;  %v1436_v43 = vld [vmem:[%s3319_s6 + $0x48] sm:$0xff]  ;;  %v1723_v31 = vld [vmem:[%s3320_s7 + $0x38] sm:$0xff] }
 0x13d   : > { %v1097_v59 = vpack.c.bf16 %v1057_v8, %v1055_v3  ;;  %v1096_v54 = vpack.c.bf16 %v1056_v12, %v1054_v4  ;;  %1460 = vperm.xlu0 %2145, %v1430_v51  }
 0x13e   : > { %1734 = vperm.xlu1 %2146, %v1716_v23   ;;  %v1050_v44 = vmax.f32 %v1018_v45, 0.0 }
 0x13f   : > { %v2867_v52 = vpop.permute.xlu1 %419  ;;  %1258 = vmatprep.subr.bf16.mxu0 %v1097_v59  ;;  %v1717_v59 = vld [vmem:[%s3320_s7 + $0x8] sm:$0xff] }
 0x140   : > { %1259 = vmatpush1.bf16.msra.mxu0 %v1096_v54  ;;  %v496_v42 = vmul.f32 %v2620_v15, %v2867_v52  ;;  %v497_v9 = vmul.f32 %v2623_v16, %v2867_v52 }
 0x141   : > { %1739 = vperm.xlu0 %2145, %v1717_v59  }
 0x142   : > { %1465 = vperm.xlu1 %2146, %v1431_v30   ;;  %v608_v40 = vadd.f32 %v2589_v60, %v496_v42  ;;  %v609_v52 = vadd.f32 %v2589_v60, %v497_v9  ;;  %v3349_v42 = vld [vmem:[#allocation11_spill] sm:$0xff] }
 0x143   : > { %v706_v9 = vmul.f32 %v2633_v24, %v3349_v42 }
 0x144   : > { %v792_v2 = vpop.permute.xlu1 %791 }
 0x145   : > { %v852_v26 = vmul.f32 %v2646_v32, %v792_v2  ;;  %v853_v62 = vmul.f32 %v2649_v46, %v792_v2  ;;  %1744 = vperm.xlu0 %2145, %v1718_v38  }
 0x146   : > { %1470 = vperm.xlu1 %2146, %v1432_v63  }
 0x147   : > { %v884_v17 = vadd.f32 %v852_v26, %v748_v13  ;;  %v885_v3 = vadd.f32 %v853_v62, %v749_v49  ;;  %v920_v13 = vpop.permute.xlu0 %919 }
 0x148   : > { %v984_v49 = vmul.f32 %v2652_v61, %v920_v13 }
 0x149   : > { %v2891_v10 = vpop.permute.xlu1 %534  ;;  %1749 = vperm.xlu0 %2145, %v1719_v53  }
 0x14a   : > { %1475 = vperm.xlu1 %2146, %v1433_v14   ;;  %v606_v26 = vadd.f32 %v2891_v10, %v494_v48 }
 0x14d   : > { %1754 = vperm.xlu0 %2145, %v1720_v7  }
 0x14e   : > { %v2908_v50 = vpop.permute.xlu1 %643  ;;  %1480 = vperm.xlu1 %2146, %v1434_v1   ;;  %v1725_v1 = vld [vmem:[%s3320_s7 + $0x48] sm:$0xff] }
 0x14f   : > { %v710_v47 = vmul.f32 %v2633_v24, %v2908_v50  ;;  %v711_v60 = vmul.f32 %v2639_v28, %v2908_v50  ;;  %v985_v50 = vmul.f32 %v2658_v0, %v920_v13 }
 0x151   : > { %1759 = vperm.xlu0 %2145, %v1721_v57   ;;  %v707_v57 = vmul.f32 %v2639_v28, %v3349_v42 }
 0x152   : > { %v648_v35 = vpop.permute.xlu1 %647  ;;  %1485 = vperm.xlu1 %2146, %v1435_v58  }
 0x153   : > { %v712_v18 = vmul.f32 %v2633_v24, %v648_v35  ;;  %v713_v36 = vmul.f32 %v2639_v28, %v648_v35  ;;  %v495_v35 = vmul.f32 %v2623_v16, %v2865_v5 }
 0x155   : > { %v744_v20 = vadd.f32 %v712_v18, %v608_v40  ;;  %v745_v33 = vadd.f32 %v713_v36, %v609_v52  ;;  %v607_v62 = vadd.f32 %v2891_v10, %v495_v35  ;;  %1764 = vperm.xlu0 %2145, %v1722_v37   ;;  %v1437_v10 = vld [vmem:[%s3319_s6 + $0x50] sm:$0xff]  ;;  %v1439_v36 = vld [vmem:[%s3319_s6 + $0x60] sm:$0xff] }
 0x156   : > { %1490 = vperm.xlu1 %2146, %v1436_v43  }
 0x157   : > { %v928_v4 = vpop.permute.xlu1 %927 }
 0x158   : > { %v988_v8 = vmul.f32 %v2652_v61, %v928_v4  ;;  %v989_v12 = vmul.f32 %v2658_v0, %v928_v4  ;;  %v742_v4 = vadd.f32 %v710_v47, %v606_v26  ;;  %v908_v47 = vpop.permute.xlu0 %907 }
 0x159   : > { %1769 = vperm.xlu0 %2145, %v1723_v31  }
 0x15a   : > { %v1020_v54 = vadd.f32 %v988_v8, %v884_v17  ;;  %v1021_v27 = vadd.f32 %v989_v12, %v885_v3  ;;  %v743_v17 = vadd.f32 %v711_v60, %v607_v62  ;;  %1495 = vperm.xlu1 %2146, %v1437_v10   ;;  %v1440_v62 = vld [vmem:[%s3319_s6 + $0x68] sm:$0xff] }
 0x15c   : > { %v1052_v2 = vmax.f32 %v1020_v54, 0.0  ;;  %v1053_v22 = vmax.f32 %v1021_v27, 0.0  ;;  %v405_v39 = vpop.permute.xlu1 %404 }
 0x15d   : > { %v490_v3 = vmul.f32 %v2620_v15, %v405_v39  ;;  %v491_v8 = vmul.f32 %v2623_v16, %v405_v39 }
 0x15e   : > { %v1095_v6 = vpack.c.bf16 %v1053_v22, %v1051_v25  ;;  %v1094_v55 = vpack.c.bf16 %v1052_v2, %v1050_v44  ;;  %v1724_v2 = vld [vmem:[%s3320_s7 + $0x40] sm:$0xff]  ;;  %v1438_v22 = vld [vmem:[%s3319_s6 + $0x58] sm:$0xff] }
 0x15f   : > { %1774 = vperm.xlu0 %2145, %v1724_v2   ;;  %1500 = vperm.xlu1 %2146, %v1438_v22   ;;  %v2147_v2 = vld [vmem:[%s3316_s3] sm:$0xff]   ;;  %v1731_v22 = vld [vmem:[%s3320_s7 + $0x78] sm:$0xff] }
 0x160   : > { %1260 = vmatprep.subr.bf16.mxu0 %v1095_v6  ;;  %v3348_v6 = vld [vmem:[#allocation7_spill] sm:$0xff] }
 0x161   : > { %v780_v41 = vpop.permute.xlu1 %779  ;;  %1261 = vmatpush1.bf16.msra.mxu0 %v1094_v55  ;;  %v602_v55 = vadd.f32 %v3348_v6, %v490_v3  ;;  %v603_v63 = vadd.f32 %v3348_v6, %v491_v8  ;;  %v1728_v8 = vld [vmem:[%s3320_s7 + $0x60] sm:$0xff]  ;;  %v2149_v6 = vld [vmem:[%s3316_s3 + $0x10] sm:$0xff]  }
 0x162   : > { %v846_v51 = vmul.f32 %v2646_v32, %v780_v41  ;;  %v847_v5 = vmul.f32 %v2649_v46, %v780_v41 }
 0x163   : > { %v738_v37 = vadd.f32 %v706_v9, %v602_v55  ;;  %v739_v48 = vadd.f32 %v707_v57, %v603_v63  ;;  %1779 = vperm.xlu0 %2145, %v1725_v1   ;;  %1505 = vperm.xlu1 %2146, %v1439_v36   ;;  %v2150_v55 = vld [vmem:[%s3316_s3 + $0x18] sm:$0xff]   ;;  %v2151_v63 = vld [vmem:[%s3316_s3 + $0x20] sm:$0xff]  }
 0x164   : > { %v878_v12 = vadd.f32 %v846_v51, %v742_v4  ;;  %v879_v59 = vadd.f32 %v847_v5, %v743_v17  ;;  %v978_v51 = vmul.f32 %v2652_v61, %v908_v47  ;;  %v979_v5 = vmul.f32 %v2658_v0, %v908_v47 }
 0x165   : > { %v784_v21 = vpop.permute.xlu1 %783 }
 0x166   : > { %v848_v19 = vmul.f32 %v2646_v32, %v784_v21  ;;  %v849_v34 = vmul.f32 %v2649_v46, %v784_v21 }
 0x167   : > { %1510 = vperm.xlu1 %2146, %v1440_v62  }
 0x168   : > { %v880_v23 = vadd.f32 %v848_v19, %v744_v20  ;;  %v881_v45 = vadd.f32 %v849_v34, %v745_v33  ;;  %v3350_v19 = vld [vmem:[#allocation6_spill] sm:$0xff]  ;;  %v1726_v33 = vld [vmem:[%s3320_s7 + $0x50] sm:$0xff] }
 0x169   : > { %v492_v34 = vmul.f32 %v2620_v15, %v3350_v19  ;;  %v493_v35 = vmul.f32 %v2623_v16, %v3350_v19  ;;  %1784 = vperm.xlu0 %2145, %v1726_v33  }
 0x16a   : > { %v2976_v29 = vpop.permute.xlu1 %529  ;;  %v1016_v27 = vadd.f32 %v984_v49, %v880_v23  ;;  %v1017_v30 = vadd.f32 %v985_v50, %v881_v45  ;;  %v1727_v50 = vld [vmem:[%s3320_s7 + $0x58] sm:$0xff] }
 0x16b   : > { %v604_v16 = vadd.f32 %v2976_v29, %v492_v34 }
 0x16c   : > { %v1049_v21 = vmax.f32 %v1017_v30, 0.0  ;;  %v1048_v7 = vmax.f32 %v1016_v27, 0.0 }
 0x16d   : > { %1789 = vperm.xlu0 %2145, %v1727_v50  }
 0x16f   : > { %v640_v56 = vpop.permute.xlu1 %639 }
 0x170   : > { %v708_v60 = vmul.f32 %v2633_v24, %v640_v56  ;;  %v709_v43 = vmul.f32 %v2639_v28, %v640_v56  ;;  %v605_v24 = vadd.f32 %v2976_v29, %v493_v35 }
 0x171   : > { %1794 = vperm.xlu0 %2145, %v1728_v8  }
 0x172   : > { %v740_v13 = vadd.f32 %v708_v60, %v604_v16  ;;  %v741_v49 = vadd.f32 %v709_v43, %v605_v24 }
 0x174   : > { %v916_v54 = vpop.permute.xlu1 %915 }
 0x175   : > { %v982_v44 = vmul.f32 %v2652_v61, %v916_v54  ;;  %v983_v25 = vmul.f32 %v2658_v0, %v916_v54 }
 0x177   : > { %v1014_v39 = vadd.f32 %v982_v44, %v878_v12  ;;  %v1015_v38 = vadd.f32 %v983_v25, %v879_v59  ;;  %v1442_v12 = vld [vmem:[%s3319_s6 + $0x78] sm:$0xff]  ;;  %v1730_v25 = vld [vmem:[%s3320_s7 + $0x70] sm:$0xff] }
 0x179   : > { %v1046_v41 = vmax.f32 %v1014_v39, 0.0  ;;  %v1047_v53 = vmax.f32 %v1015_v38, 0.0  ;;  %v772_v14 = vpop.permute.xlu1 %771  ;;  %v1886_v39 = vld [vmem:[#allocation2] sm:$0x1]  ;;  %v2148_v38 = vld [vmem:[%s3316_s3 + $0x8] sm:$0xff]  }
 0x17a   : > { %v842_v58 = vmul.f32 %v2646_v32, %v772_v14  ;;  %v843_v18 = vmul.f32 %v2649_v46, %v772_v14  ;;  %v2154_v14 = vld [vmem:[%s3316_s3 + $0x38] sm:$0xff]  }
 0x17b   : > { %v1093_v40 = vpack.c.bf16 %v1049_v21, %v1047_v53  ;;  %v1092_v52 = vpack.c.bf16 %v1048_v7, %v1046_v41  ;;  %v2152_v41 = vld [vmem:[%s3316_s3 + $0x28] sm:$0xff]   ;;  %v2153_v53 = vld [vmem:[%s3316_s3 + $0x30] sm:$0xff]  }
 0x17c   : > { %v874_v26 = vadd.f32 %v842_v58, %v738_v37  ;;  %v875_v15 = vadd.f32 %v843_v18, %v739_v48 }
 0x17d   : > { %v776_v20 = vpop.permute.xlu1 %775  ;;  %1262 = vmatprep.subr.bf16.mxu0 %v1093_v40 }
 0x17e   : > { %1263 = vmatpush1.bf16.msra.mxu0 %v1092_v52  ;;  %v844_v28 = vmul.f32 %v2646_v32, %v776_v20  ;;  %v845_v56 = vmul.f32 %v2649_v46, %v776_v20  ;;  %v1010_v23 = vadd.f32 %v978_v51, %v874_v26  ;;  %v1011_v45 = vadd.f32 %v979_v5, %v875_v15  ;;  %v1441_v32 = vld [vmem:[%s3319_s6 + $0x70] sm:$0xff]  ;;  %v3111_v7 = vpop.permute.xlu0 %1194 }
 0x17f   : > { %1515 = vperm.xlu1 %2146, %v1441_v32  }
 0x180   : > { %v876_v46 = vadd.f32 %v844_v28, %v740_v13  ;;  %v877_v29 = vadd.f32 %v845_v56, %v741_v49  ;;  %v1043_v27 = vmax.f32 %v1011_v45, 0.0  ;;  %v1042_v30 = vmax.f32 %v1010_v23, 0.0 }
 0x182   : > { %v912_v31 = vpop.permute.xlu1 %911 }
 0x183   : > { %v980_v4 = vmul.f32 %v2652_v61, %v912_v31  ;;  %v981_v17 = vmul.f32 %v2658_v0, %v912_v31  ;;  %1520 = vperm.xlu1 %2146, %v1442_v12   ;;  %v1729_v0 = vld [vmem:[%s3320_s7 + $0x68] sm:$0xff] }
 0x184   : > { %1799 = vperm.xlu0 %2145, %v1729_v0  }
 0x185   : > { %v1012_v10 = vadd.f32 %v980_v4, %v876_v46  ;;  %v1013_v3 = vadd.f32 %v981_v17, %v877_v29 }
 0x187   : > { %v1044_v59 = vmax.f32 %v1012_v10, 0.0  ;;  %v1045_v54 = vmax.f32 %v1013_v3, 0.0  ;;  %1804 = vperm.xlu1 %2146, %v1730_v25   ;;  %v3109_v21 = vpop.permute.xlu1 %1199 }
 0x188   : > { %1809 = vperm.xlu0 %2145, %v1731_v22  }
 0x189   : > { %v1091_v61 = vpack.c.bf16 %v1045_v54, %v1043_v27  ;;  %v1090_v44 = vpack.c.bf16 %v1044_v59, %v1042_v30 }
 0x18b   : > { %1264 = vmatprep.subr.bf16.mxu0 %v1091_v61  ;;  %1889 = vperm.xlu1 %2146, %v1886_v39  }
 0x18c   : > { %1265 = vmatpush1.bf16.msra.mxu0 %v1090_v44 }
 0x18f   : > { %1283 = vmatmul.mubr.bf16.vlgmr.msra.gmra.mxu0 %v2147_v2 }
 0x190   : > { %1292 = vmatprep.mubr.bf16.mxu0 %v3345_v11 }
 0x191   : > { %v3113_v1 = vpop.permute.xlu1 %1184 }
 0x197   : > { %1293 = vmatmul.mubr.bf16.gmra.mxu0 %v2148_v38 }
 0x198   : > { %1302 = vmatprep.mubr.bf16.mxu0 %v3345_v11  ;;  %v3115_v42 = vpop.permute.xlu0 %1189  ;;  %v3117_v9 = vpop.permute.xlu1 %1174 }
 0x19c   : > { %v3119_v57 = vpop.permute.xlu0 %1179  ;;  %v3121_v58 = vpop.permute.xlu1 %1164 }
 0x19f   : > { %1303 = vmatmul.mubr.bf16.gmra.mxu0 %v2149_v6 }
 0x1a0   : > { %1312 = vmatprep.mubr.bf16.mxu0 %v3345_v11  ;;  %v3123_v18 = vpop.permute.xlu0 %1169  ;;  %v3125_v36 = vpop.permute.xlu1 %1154 }
 0x1a4   : > { %v3127_v40 = vpop.permute.xlu0 %1159  ;;  %v3129_v52 = vpop.permute.xlu1 %1144 }
 0x1a7   : > { %1313 = vmatmul.mubr.bf16.gmra.mxu0 %v2150_v55 }
 0x1a8   : > { %1322 = vmatprep.mubr.bf16.mxu0 %v3345_v11  ;;  %v3131_v19 = vpop.permute.xlu0 %1149  ;;  %v1135_v34 = vpop.permute.xlu1 %1134 }
 0x1ac   : > { %v1140_v37 = vpop.permute.xlu0 %1139  ;;  %v1125_v35 = vpop.permute.xlu1 %1124 }
 0x1af   : > { %1323 = vmatmul.mubr.bf16.gmra.mxu0 %v2151_v63 }
 0x1b0   : > { %1332 = vmatprep.mubr.bf16.mxu0 %v3345_v11  ;;  %v1130_v43 = vpop.permute.xlu0 %1129 }
 0x1b7   : > { %1333 = vmatmul.mubr.bf16.gmra.mxu0 %v2152_v41 }
 0x1b8   : > { %1342 = vmatprep.mubr.bf16.mxu0 %v3345_v11 }
 0x1bf   : > { %1343 = vmatmul.mubr.bf16.gmra.mxu0 %v2153_v53 }
 0x1c0   : > { %1352 = vmatprep.mubr.bf16.mxu0 %v3345_v11 }
 0x1c7   : > { %1353 = vmatmul.mubr.bf16.gmra.mxu0 %v2154_v14 }
 0x24f   : > { %v1284_v48 = vpop.f32.mrf.mxu0 }
 0x250   : > { %v1285_v60 = vadd.f32 %v1284_v48, %v1125_v35 }
 0x251   : > { %v1286_v47 = vpop.f32.mrf.mxu0 }
 0x252   : > { %v1287_v33 = vadd.f32 %v1286_v47, %v1125_v35  ;;  %v1363_v62 = vmax.f32 %v1285_v60, 0.0 }
 0x253   : > { %v1288_v20 = vpop.f32.mrf.mxu0 }
 0x254   : > { %v1289_v26 = vadd.f32 %v1288_v20, %v1130_v43  ;;  %v1364_v56 = vmax.f32 %v1287_v33, 0.0 }
 0x255   : > { %v1290_v15 = vpop.f32.mrf.mxu0 }
 0x256   : > { %v1365_v16 = vmax.f32 %v1289_v26, 0.0  ;;  %v1291_v24 = vadd.f32 %v1290_v15, %v1130_v43 }
 0x257   : > { %v1294_v28 = vpop.f32.mrf.mxu0 }
 0x258   : > { %v3133_v51 = vpack.c.bf16 %v1365_v16, %v1363_v62  ;;  %v1366_v5 = vmax.f32 %v1291_v24, 0.0  ;;  %v1295_v50 = vadd.f32 %v1294_v28, %v1135_v34 }
 0x259   : > { %v1296_v13 = vpop.f32.mrf.mxu0 }
 0x25a   : > { %v3135_v49 = vpack.c.bf16 %v1366_v5, %v1364_v56  ;;  %v1297_v45 = vadd.f32 %v1296_v13, %v1135_v34  ;;  %v1367_v46 = vmax.f32 %v1295_v50, 0.0 }
 0x25b   : > { %v1298_v23 = vpop.f32.mrf.mxu0 }
 0x25c   : > { %v1299_v31 = vadd.f32 %v1298_v23, %v1140_v37  ;;  %v1368_v10 = vmax.f32 %v1297_v45, 0.0 }
 0x25d   : > { %v1300_v32 = vpop.f32.mrf.mxu0 }
 0x25e   : > { %v1369_v29 = vmax.f32 %v1299_v31, 0.0  ;;  %v1301_v4 = vadd.f32 %v1300_v32, %v1140_v37 }
 0x25f   : > { %v3137_v17 = vpop.f32.mrf.mxu0 }
 0x260   : > { %v3139_v3 = vpack.c.bf16 %v1369_v29, %v1367_v46  ;;  %v1370_v8 = vmax.f32 %v1301_v4, 0.0 }
 0x261   : > { %v3141_v12 = vpop.f32.mrf.mxu0 }
 0x262   : > { %v3143_v59 = vpack.c.bf16 %v1370_v8, %v1368_v10 }
 0x263   : > { %v3145_v54 = vpop.f32.mrf.mxu0 }
 0x265   : > { %v3147_v27 = vpop.f32.mrf.mxu0 }
 0x267   : > { %v3149_v30 = vpop.f32.mrf.mxu0 }
 0x269   : > { %v1316_v61 = vpop.f32.mrf.mxu0 }
 0x26b   : > { %v1318_v44 = vpop.f32.mrf.mxu0 }
 0x26d   : > { %v1320_v0 = vpop.f32.mrf.mxu0 }
 0x26f   : > { %v1324_v25 = vpop.f32.mrf.mxu0 }
 0x271   : > { %v1326_v2 = vpop.f32.mrf.mxu0 }
 0x273   : > { %v1328_v22 = vpop.f32.mrf.mxu0 }
 0x275   : > { %v1330_v39 = vpop.f32.mrf.mxu0 }
 0x277   : > { %v1334_v38 = vpop.f32.mrf.mxu0 }
 0x278   : > { %v1335_v4 = vadd.f32 %v1334_v38, %v3117_v9 }
 0x279   : > { %v1336_v6 = vpop.f32.mrf.mxu0 }
 0x27a   : > { %v1337_v23 = vadd.f32 %v1336_v6, %v3117_v9  ;;  %v1329_v6 = vadd.f32 %v1328_v22, %v3123_v18  ;;  %v1317_v9 = vadd.f32 %v1316_v61, %v3125_v36 }
 0x27b   : > { %v1338_v55 = vpop.f32.mrf.mxu0 }
 0x27c   : > { %v1339_v31 = vadd.f32 %v1338_v55, %v3119_v57  ;;  %v1384_v8 = vmax.f32 %v1337_v23, 0.0  ;;  %v1376_v61 = vmax.f32 %v1317_v9, 0.0 }
 0x27d   : > { %v1340_v63 = vpop.f32.mrf.mxu0 }
 0x27e   : > { %v1341_v24 = vadd.f32 %v1340_v63, %v3119_v57  ;;  %v1385_v63 = vmax.f32 %v1339_v31, 0.0  ;;  %v1321_v57 = vadd.f32 %v1320_v0, %v3127_v40  ;;  %v1315_v0 = vadd.f32 %v3149_v30, %v3125_v36 }
 0x27f   : > { %v1344_v41 = vpop.f32.mrf.mxu0 }
 0x280   : > { %v1345_v13 = vadd.f32 %v1344_v41, %v3113_v1  ;;  %v1378_v22 = vmax.f32 %v1321_v57, 0.0 }
 0x281   : > { %v1346_v53 = vpop.f32.mrf.mxu0 }
 0x282   : > { %v1347_v26 = vadd.f32 %v1346_v53, %v3113_v1  ;;  %v1387_v10 = vmax.f32 %v1345_v13, 0.0  ;;  %v1327_v1 = vadd.f32 %v1326_v2, %v3121_v58  ;;  %v1319_v2 = vadd.f32 %v1318_v44, %v3127_v40 }
 0x283   : > { %v1348_v14 = vpop.f32.mrf.mxu0  ;;  %v1309_v40 = vadd.f32 %v3145_v54, %v3131_v19  ;;  %v2162_v54 = vld [vmem:[%s3318_s5 + $0x38] sm:$0xff]  }
 0x284   : > { %v1349_v62 = vadd.f32 %v1348_v14, %v3115_v42  ;;  %v1388_v45 = vmax.f32 %v1347_v26, 0.0  ;;  %v1383_v14 = vmax.f32 %v1335_v4, 0.0  ;;  %v1380_v38 = vmax.f32 %v1327_v1, 0.0 }
 0x285   : > { %v1350_v34 = vpop.f32.mrf.mxu0  ;;  %v1377_v44 = vmax.f32 %v1319_v2, 0.0  ;;  %v1373_v30 = vmax.f32 %v1309_v40, 0.0 }
 0x286   : > { %v1351_v47 = vadd.f32 %v1350_v34, %v3115_v42  ;;  %v1389_v32 = vmax.f32 %v1349_v62, 0.0  ;;  %v1386_v42 = vmax.f32 %v1341_v24, 0.0  ;;  %v1381_v34 = vmax.f32 %v1329_v6, 0.0  ;;  %v1451_v62 = vpop.permute.xlu0 %1450 }
 0x287   : > { %v1354_v37 = vpop.f32.mrf.mxu0 }
 0x288   : > { %v1355_v20 = vadd.f32 %v1354_v37, %v3111_v7  ;;  %v1390_v28 = vmax.f32 %v1351_v47, 0.0  ;;  %v1423_v41 = vpack.c.bf16 %v1389_v32, %v1387_v10  ;;  %v1422_v53 = vpack.c.bf16 %v1386_v42, %v1384_v8 }
 0x289   : > { %v1356_v48 = vpop.f32.mrf.mxu0  ;;  %v1421_v37 = vpack.c.bf16 %v1385_v63, %v1383_v14 }
 0x28a   : > { %v1357_v60 = vadd.f32 %v1356_v48, %v3111_v7  ;;  %v1391_v50 = vmax.f32 %v1355_v20, 0.0  ;;  %v1424_v29 = vpack.c.bf16 %v1390_v28, %v1388_v45  ;;  %v1461_v24 = vpop.permute.xlu0 %1460 }
 0x28b   : > { %v1358_v35 = vpop.f32.mrf.mxu0 }
 0x28c   : > { %v1359_v43 = vadd.f32 %v1358_v35, %v3109_v21  ;;  %v1392_v56 = vmax.f32 %v1357_v60, 0.0  ;;  %v1418_v60 = vpack.c.bf16 %v1378_v22, %v1376_v61 }
 0x28d   : > { %v1360_v33 = vpop.f32.mrf.mxu0 }
 0x28e   : > { %v1361_v15 = vadd.f32 %v1360_v33, %v3109_v21  ;;  %v1393_v16 = vmax.f32 %v1359_v43, 0.0  ;;  %v1331_v21 = vadd.f32 %v1330_v39, %v3123_v18  ;;  %v1325_v39 = vadd.f32 %v1324_v25, %v3121_v58 }
 0x28f   : > { %v1311_v18 = vadd.f32 %v3147_v27, %v3131_v19  ;;  %v1307_v58 = vadd.f32 %v3141_v12, %v3129_v52  ;;  %v1305_v27 = vadd.f32 %v3137_v17, %v3129_v52  ;;  %v1375_v43 = vmax.f32 %v1315_v0, 0.0  ;;  %v2155_v52 = vld [vmem:[%s3318_s5] sm:$0xff]   ;;  %v2156_v19 = vld [vmem:[%s3318_s5 + $0x8] sm:$0xff]  }
 0x290   : > { %v1394_v5 = vmax.f32 %v1361_v15, 0.0  ;;  %v1425_v46 = vpack.c.bf16 %v1393_v16, %v1391_v50  ;;  %v1382_v55 = vmax.f32 %v1331_v21, 0.0  ;;  %v1379_v35 = vmax.f32 %v1325_v39, 0.0  ;;  %v2159_v17 = vld [vmem:[%s3318_s5 + $0x20] sm:$0xff]   ;;  %v1446_v15 = vpop.permute.xlu1 %1445 }
 0x291   : > { %v1374_v47 = vmax.f32 %v1311_v18, 0.0  ;;  %v1372_v36 = vmax.f32 %v1307_v58, 0.0  ;;  %v1417_v20 = vpack.c.bf16 %v1377_v44, %v1375_v43  ;;  %v1371_v12 = vmax.f32 %v1305_v27, 0.0 }
 0x292   : > { %v1426_v7 = vpack.c.bf16 %v1394_v5, %v1392_v56  ;;  %v1420_v48 = vpack.c.bf16 %v1382_v55, %v1380_v38  ;;  %v1419_v25 = vpack.c.bf16 %v1381_v34, %v1379_v35  ;;  %v1740_v56 = vpop.permute.xlu0 %1739 }
 0x293   : > { %v1416_v33 = vpack.c.bf16 %v1374_v47, %v1372_v36  ;;  %v1415_v26 = vpack.c.bf16 %v1373_v30, %v1371_v12 }
 0x294   : > { %1571 = vmatprep.subr.bf16.mxu1 %v1426_v7  ;;  %v1456_v16 = vpop.permute.xlu1 %1455 }
 0x295   : > { %1572 = vmatpush1.bf16.msra.mxu1 %v1425_v46 }
 0x296   : > { %1573 = vmatprep.subr.bf16.mxu1 %v1424_v29  ;;  %v1745_v13 = vpop.permute.xlu0 %1744 }
 0x298   : > { %v1735_v28 = vpop.permute.xlu1 %1734 }
 0x299   : > { %1574 = vmatpush1.bf16.msra.mxu1 %v1423_v41 }
 0x29a   : > { %1575 = vmatprep.subr.bf16.mxu1 %v1422_v53  ;;  %v3215_v23 = vpop.permute.xlu0 %1749 }
 0x29c   : > { %v1466_v5 = vpop.permute.xlu1 %1465 }
 0x29d   : > { %1576 = vmatpush1.bf16.msra.mxu1 %v1421_v37 }
 0x29e   : > { %1577 = vmatprep.subr.bf16.mxu1 %v1420_v48  ;;  %v3219_v31 = vpop.permute.xlu0 %1754 }
 0x2a0   : > { %v1471_v50 = vpop.permute.xlu1 %1470 }
 0x2a1   : > { %1578 = vmatpush1.bf16.msra.mxu1 %v1419_v25 }
 0x2a2   : > { %1579 = vmatprep.subr.bf16.mxu1 %v1418_v60  ;;  %v3223_v29 = vpop.permute.xlu0 %1759 }
 0x2a4   : > { %v3217_v45 = vpop.permute.xlu1 %1475 }
 0x2a5   : > { %1580 = vmatpush1.bf16.msra.mxu1 %v1417_v20 }
 0x2a6   : > { %1581 = vmatprep.subr.bf16.mxu1 %v1416_v33  ;;  %v3227_v6 = vpop.permute.xlu0 %1764 }
 0x2a8   : > { %v3221_v46 = vpop.permute.xlu1 %1480 }
 0x2a9   : > { %1582 = vmatpush1.bf16.msra.mxu1 %v1415_v26 }
 0x2aa   : > { %1583 = vmatprep.subr.bf16.mxu1 %v3143_v59  ;;  %v2161_v59 = vld [vmem:[%s3318_s5 + $0x30] sm:$0xff]   ;;  %v3231_v53 = vpop.permute.xlu0 %1769 }
 0x2ac   : > { %v3225_v10 = vpop.permute.xlu1 %1485 }
 0x2ad   : > { %1584 = vmatpush1.bf16.msra.mxu1 %v3139_v3  ;;  %v2160_v3 = vld [vmem:[%s3318_s5 + $0x28] sm:$0xff]  }
 0x2ae   : > { %1585 = vmatprep.subr.bf16.mxu1 %v3135_v49  ;;  %v2157_v49 = vld [vmem:[%s3318_s5 + $0x10] sm:$0xff]   ;;  %v3235_v48 = vpop.permute.xlu0 %1774 }
 0x2b0   : > { %v3229_v41 = vpop.permute.xlu1 %1490 }
 0x2b1   : > { %1586 = vmatpush1.bf16.msra.mxu1 %v3133_v51  ;;  %v2158_v51 = vld [vmem:[%s3318_s5 + $0x18] sm:$0xff]  }
 0x2b4   : > { %1604 = vmatmul.mubr.bf16.vlgmr.msra.gmra.mxu1 %v2155_v52  ;;  %v3233_v14 = vpop.permute.xlu1 %1495 }
 0x2b5   : > { %1613 = vmatprep.mubr.bf16.mxu1 %v3345_v11 }
 0x2b8   : > { %v3237_v44 = vpop.permute.xlu1 %1500 }
 0x2bc   : > { %1614 = vmatmul.mubr.bf16.gmra.mxu1 %v2156_v19 }
 0x2bd   : > { %1623 = vmatprep.mubr.bf16.mxu1 %v3345_v11 }
 0x2c4   : > { %1624 = vmatmul.mubr.bf16.gmra.mxu1 %v2157_v49  ;;  %v3239_v49 = vpop.permute.xlu0 %1779 }
 0x2c5   : > { %1633 = vmatprep.mubr.bf16.mxu1 %v3345_v11 }
 0x2cc   : > { %1634 = vmatmul.mubr.bf16.gmra.mxu1 %v2158_v51 }
 0x2cd   : > { %1643 = vmatprep.mubr.bf16.mxu1 %v3345_v11 }
 0x2d4   : > { %1644 = vmatmul.mubr.bf16.gmra.mxu1 %v2159_v17 }
 0x2d5   : > { %1653 = vmatprep.mubr.bf16.mxu1 %v3345_v11 }
 0x2dc   : > { %1654 = vmatmul.mubr.bf16.gmra.mxu1 %v2160_v3 }
 0x2dd   : > { %1663 = vmatprep.mubr.bf16.mxu1 %v3345_v11 }
 0x2e4   : > { %1664 = vmatmul.mubr.bf16.gmra.mxu1 %v2161_v59 }
 0x2e5   : > { %1673 = vmatprep.mubr.bf16.mxu1 %v3345_v11 }
 0x2ec   : > { %1674 = vmatmul.mubr.bf16.gmra.mxu1 %v2162_v54 }
 0x374   : > { %v1605_v7 = vpop.f32.mrf.mxu1 }
 0x375   : > { %v1606_v2 = vadd.f32 %v1605_v7, %v1446_v15 }
 0x376   : > { %v1607_v11 = vpop.f32.mrf.mxu1 }
 0x377   : > { %v1608_v22 = vadd.f32 %v1607_v11, %v1446_v15  ;;  %v1684_v40 = vmax.f32 %v1606_v2, 0.0 }
 0x378   : > { %v1609_v32 = vpop.f32.mrf.mxu1 }
 0x379   : > { %v1610_v9 = vadd.f32 %v1609_v32, %v1451_v62  ;;  %v1685_v36 = vmax.f32 %v1608_v22, 0.0  ;;  %v1812_v52 = vmul.f32 %v1735_v28, %v1684_v40 }
 0x37a   : > { %v1611_v21 = vpop.f32.mrf.mxu1 }
 0x37b   : > { %v1612_v34 = vadd.f32 %v1611_v21, %v1451_v62  ;;  %v1686_v0 = vmax.f32 %v1610_v9, 0.0  ;;  %v1813_v15 = vmul.f32 %v1735_v28, %v1685_v36  ;;  %v1785_v9 = vpop.permute.xlu0 %1784 }
 0x37c   : > { %v1615_v42 = vpop.f32.mrf.mxu1 }
 0x37d   : > { %v1616_v37 = vadd.f32 %v1615_v42, %v1456_v16  ;;  %v1687_v25 = vmax.f32 %v1612_v34, 0.0  ;;  %v1814_v30 = vmul.f32 %v1740_v56, %v1686_v0 }
 0x37e   : > { %v1617_v4 = vpop.f32.mrf.mxu1 }
 0x37f   : > { %v1618_v35 = vadd.f32 %v1617_v4, %v1456_v16  ;;  %v1688_v47 = vmax.f32 %v1616_v37, 0.0  ;;  %v1815_v51 = vmul.f32 %v1740_v56, %v1687_v25  ;;  %v1844_v7 = vadd.f32 %v1814_v30, %v1812_v52 }
 0x380   : > { %v1619_v1 = vpop.f32.mrf.mxu1 }
 0x381   : > { %v1620_v58 = vadd.f32 %v1619_v1, %v1461_v24  ;;  %v1689_v20 = vmax.f32 %v1618_v35, 0.0  ;;  %v1816_v17 = vmul.f32 %v1745_v13, %v1688_v47  ;;  %v1865_v1 = vadd.f32 %v1815_v51, %v1813_v15 }
 0x382   : > { %v1621_v8 = vpop.f32.mrf.mxu1 }
 0x383   : > { %v1622_v60 = vadd.f32 %v1621_v8, %v1461_v24  ;;  %v1690_v33 = vmax.f32 %v1620_v58, 0.0  ;;  %v3242_v24 = vpop.permute.xlu1 %1505  ;;  %v1817_v11 = vmul.f32 %v1745_v13, %v1689_v20  ;;  %v1845_v8 = vadd.f32 %v1844_v7, %v1816_v17 }
 0x384   : > { %v1625_v63 = vpop.f32.mrf.mxu1 }
 0x385   : > { %v1626_v27 = vadd.f32 %v1625_v63, %v1466_v5  ;;  %v1691_v3 = vmax.f32 %v1622_v60, 0.0 }
 0x386   : > { %v1627_v57 = vpop.f32.mrf.mxu1 }
 0x387   : > { %v1628_v12 = vadd.f32 %v1627_v57, %v1466_v5  ;;  %v1692_v59 = vmax.f32 %v1626_v27, 0.0  ;;  %v1818_v5 = vmul.f32 %v3215_v23, %v1690_v33  ;;  %v1819_v28 = vmul.f32 %v3215_v23, %v1691_v3  ;;  %v1511_v0 = vpop.permute.xlu1 %1510 }
 0x388   : > { %v1629_v55 = vpop.f32.mrf.mxu1 }
 0x389   : > { %v1630_v19 = vadd.f32 %v1629_v55, %v1471_v50  ;;  %v1693_v32 = vmax.f32 %v1628_v12, 0.0  ;;  %v1846_v2 = vadd.f32 %v1845_v8, %v1818_v5  ;;  %v1790_v12 = vpop.permute.xlu0 %1789 }
 0x38a   : > { %v1631_v39 = vpop.f32.mrf.mxu1 }
 0x38b   : > { %v1632_v62 = vadd.f32 %v1631_v39, %v1471_v50  ;;  %v1694_v42 = vmax.f32 %v1630_v19, 0.0  ;;  %v1820_v50 = vmul.f32 %v3219_v31, %v1692_v59  ;;  %v1516_v59 = vpop.permute.xlu1 %1515 }
 0x38c   : > { %v1635_v38 = vpop.f32.mrf.mxu1 }
 0x38d   : > { %v1636_v16 = vadd.f32 %v1635_v38, %v3217_v45  ;;  %v1695_v57 = vmax.f32 %v1632_v62, 0.0  ;;  %v1866_v38 = vadd.f32 %v1865_v1, %v1817_v11  ;;  %v1822_v37 = vmul.f32 %v3223_v29, %v1694_v42  ;;  %v1795_v1 = vpop.permute.xlu0 %1794 }
 0x38e   : > { %v1637_v18 = vpop.f32.mrf.mxu1  ;;  %v1847_v58 = vadd.f32 %v1846_v2, %v1820_v50 }
 0x38f   : > { %v1638_v4 = vadd.f32 %v1637_v18, %v3217_v45  ;;  %v1696_v55 = vmax.f32 %v1636_v16, 0.0  ;;  %v1821_v45 = vmul.f32 %v3219_v31, %v1693_v32  ;;  %v1867_v35 = vadd.f32 %v1866_v38, %v1819_v28 }
 0x390   : > { %v1639_v61 = vpop.f32.mrf.mxu1  ;;  %v1823_v40 = vmul.f32 %v3223_v29, %v1695_v57  ;;  %v1848_v30 = vadd.f32 %v1847_v58, %v1822_v37 }
 0x391   : > { %v1640_v56 = vadd.f32 %v1639_v61, %v3221_v46  ;;  %v1697_v18 = vmax.f32 %v1638_v4, 0.0  ;;  %v1824_v25 = vmul.f32 %v3227_v6, %v1696_v55  ;;  %v1868_v31 = vadd.f32 %v1867_v35, %v1821_v45  ;;  %v1521_v55 = vpop.permute.xlu1 %1520 }
 0x392   : > { %v1641_v43 = vpop.f32.mrf.mxu1 }
 0x393   : > { %v1642_v13 = vadd.f32 %v1641_v43, %v3221_v46  ;;  %v1698_v22 = vmax.f32 %v1640_v56, 0.0  ;;  %v1869_v51 = vadd.f32 %v1868_v31, %v1823_v40  ;;  %v1849_v17 = vadd.f32 %v1848_v30, %v1824_v25 }
 0x394   : > { %v1645_v26 = vpop.f32.mrf.mxu1 }
 0x395   : > { %v1646_v39 = vadd.f32 %v1645_v26, %v3225_v10  ;;  %v1699_v47 = vmax.f32 %v1642_v13, 0.0  ;;  %v1826_v20 = vmul.f32 %v3231_v53, %v1698_v22 }
 0x396   : > { %v1647_v54 = vpop.f32.mrf.mxu1 }
 0x397   : > { %v1648_v23 = vadd.f32 %v1647_v54, %v3225_v10  ;;  %v1700_v60 = vmax.f32 %v1646_v39, 0.0  ;;  %v1825_v10 = vmul.f32 %v3227_v6, %v1697_v18  ;;  %v1850_v7 = vadd.f32 %v1849_v17, %v1826_v20 }
 0x398   : > { %v1649_v21 = vpop.f32.mrf.mxu1 }
 0x399   : > { %v1650_v61 = vadd.f32 %v1649_v21, %v3229_v41  ;;  %v1701_v33 = vmax.f32 %v1648_v23, 0.0  ;;  %v1828_v3 = vmul.f32 %v3235_v48, %v1700_v60  ;;  %v1870_v16 = vadd.f32 %v1869_v51, %v1825_v10 }
 0x39a   : > { %v1651_v63 = vpop.f32.mrf.mxu1 }
 0x39b   : > { %v1652_v27 = vadd.f32 %v1651_v63, %v3229_v41  ;;  %v1702_v26 = vmax.f32 %v1650_v61, 0.0  ;;  %v1827_v41 = vmul.f32 %v3231_v53, %v1699_v47  ;;  %v1829_v11 = vmul.f32 %v3235_v48, %v1701_v33  ;;  %v1800_v61 = vpop.permute.xlu0 %1799 }
 0x39c   : > { %v1655_v34 = vpop.f32.mrf.mxu1  ;;  %v1851_v4 = vadd.f32 %v1850_v7, %v1828_v3 }
 0x39d   : > { %v1656_v43 = vadd.f32 %v1655_v34, %v3233_v14  ;;  %v1703_v54 = vmax.f32 %v1652_v27, 0.0  ;;  %v1830_v5 = vmul.f32 %v3239_v49, %v1702_v26  ;;  %v1871_v53 = vadd.f32 %v1870_v16, %v1827_v41  ;;  %v1805_v27 = vpop.permute.xlu1 %1804 }
 0x39e   : > { %v1657_v46 = vpop.f32.mrf.mxu1 }
 0x39f   : > { %v1658_v29 = vadd.f32 %v1657_v46, %v3233_v14  ;;  %v1704_v15 = vmax.f32 %v1656_v43, 0.0  ;;  %v1831_v8 = vmul.f32 %v3239_v49, %v1703_v54  ;;  %v1872_v57 = vadd.f32 %v1871_v53, %v1829_v11  ;;  %v1810_v17 = vpop.permute.xlu0 %1809 }
 0x3a0   : > { %v1659_v36 = vpop.f32.mrf.mxu1  ;;  %v1852_v13 = vadd.f32 %v1851_v4, %v1830_v5 }
 0x3a1   : > { %v1660_v52 = vadd.f32 %v1659_v36, %v3237_v44  ;;  %v1705_v32 = vmax.f32 %v1658_v29, 0.0  ;;  %v1873_v18 = vadd.f32 %v1872_v57, %v1831_v8 }
 0x3a2   : > { %v1661_v19 = vpop.f32.mrf.mxu1 }
 0x3a3   : > { %v1662_v6 = vadd.f32 %v1661_v19, %v3237_v44  ;;  %v1706_v21 = vmax.f32 %v1660_v52, 0.0  ;;  %v1832_v44 = vmul.f32 %v1785_v9, %v1704_v15  ;;  %v1833_v39 = vmul.f32 %v1785_v9, %v1705_v32 }
 0x3a4   : > { %v1665_v62 = vpop.f32.mrf.mxu1 }
 0x3a5   : > { %v1666_v14 = vadd.f32 %v1665_v62, %v3242_v24  ;;  %v1707_v28 = vmax.f32 %v1662_v6, 0.0  ;;  %v1834_v38 = vmul.f32 %v1790_v12, %v1706_v21  ;;  %v1853_v22 = vadd.f32 %v1852_v13, %v1832_v44  ;;  %v3351_v21 = vld [vmem:[#allocation8_spill] sm:$0xff] }
 0x3a6   : > { %v1667_v42 = vpop.f32.mrf.mxu1  ;;  %v1874_v46 = vadd.f32 %v1873_v18, %v1833_v39 }
 0x3a7   : > { %v1668_v56 = vadd.f32 %v1667_v42, %v3242_v24  ;;  %v1708_v50 = vmax.f32 %v1666_v14, 0.0  ;;  %v1835_v24 = vmul.f32 %v1790_v12, %v1707_v28  ;;  %v1854_v40 = vadd.f32 %v1853_v22, %v1834_v38 }
 0x3a8   : > { %v1669_v63 = vpop.f32.mrf.mxu1  ;;  %v1894_v42 = vsub.s32 0, %v3351_v21 }
 0x3a9   : > { %v1670_v48 = vadd.f32 %v1669_v63, %v1511_v0  ;;  %v1709_v2 = vmax.f32 %v1668_v56, 0.0  ;;  %v1836_v23 = vmul.f32 %v1795_v1, %v1708_v50  ;;  %v1875_v43 = vadd.f32 %v1874_v46, %v1835_v24  ;;  %v1890_v56 = vpop.permute.xlu1 %1889 }
 0x3aa   : > { %v1671_v45 = vpop.f32.mrf.mxu1  ;;  %v1895_v44 = vrot.slane %v1890_v56, %v1894_v42 }
 0x3ab   : > { %v1710_v34 = vmax.f32 %v1670_v48, 0.0  ;;  %v1672_v37 = vadd.f32 %v1671_v45, %v1511_v0  ;;  %v1837_v25 = vmul.f32 %v1795_v1, %v1709_v2  ;;  %v1855_v36 = vadd.f32 %v1854_v40, %v1836_v23 }
 0x3ac   : > { %v1675_v35 = vpop.f32.mrf.mxu1 }
 0x3ad   : > { %v1711_v49 = vmax.f32 %v1672_v37, 0.0  ;;  %v1676_v58 = vadd.f32 %v1675_v35, %v1516_v59  ;;  %v1838_v60 = vmul.f32 %v1800_v61, %v1710_v34  ;;  %v1876_v12 = vadd.f32 %v1875_v43, %v1837_v25 }
 0x3ae   : > { %v1677_v47 = vpop.f32.mrf.mxu1 }
 0x3af   : > { %v1712_v31 = vmax.f32 %v1676_v58, 0.0  ;;  %v1678_v9 = vadd.f32 %v1677_v47, %v1516_v59  ;;  %v1839_v0 = vmul.f32 %v1800_v61, %v1711_v49  ;;  %v1856_v29 = vadd.f32 %v1855_v36, %v1838_v60 }
 0x3b0   : > { %v1679_v30 = vpop.f32.mrf.mxu1 }
 0x3b1   : > { %v1840_v10 = vmul.f32 %v1805_v27, %v1712_v31  ;;  %v1713_v20 = vmax.f32 %v1678_v9, 0.0  ;;  %v1680_v33 = vadd.f32 %v1679_v30, %v1521_v55  ;;  %v1877_v41 = vadd.f32 %v1876_v12, %v1839_v0 }
 0x3b2   : > { %v1681_v26 = vpop.f32.mrf.mxu1 }
 0x3b3   : > { %v1841_v52 = vmul.f32 %v1805_v27, %v1713_v20  ;;  %v1714_v19 = vmax.f32 %v1680_v33, 0.0  ;;  %v1682_v51 = vadd.f32 %v1681_v26, %v1521_v55  ;;  %v1857_v3 = vadd.f32 %v1856_v29, %v1840_v10  ;;  %v3352_v10 = vld [vmem:[#allocation9_spill] sm:$0xff]  ;;  %v3353_v33 = vld [vmem:[#allocation10_spill] sm:$0xff] }
 0x3b5   : > { %v1842_v54 = vmul.f32 %v1810_v17, %v1714_v19  ;;  %v1715_v15 = vmax.f32 %v1682_v51, 0.0  ;;  %v1878_v59 = vadd.f32 %v1877_v41, %v1841_v52 }
 0x3b7   : > { %v1858_v6 = vadd.f32 %v1857_v3, %v1842_v54  ;;  %v1843_v62 = vmul.f32 %v1810_v17, %v1715_v15 }
 0x3b9   : > { %v1859_v16 = vrot.slane %v1858_v6, 4  ;;  %v1879_v7 = vadd.f32 %v1878_v59, %v1843_v62 }
 0x3bb   : > { %v1860_v11 = vadd.f32 %v1859_v16, %v1858_v6  ;;  %v1880_v14 = vrot.slane %v1879_v7, 4 }
 0x3bd   : > { %v1861_v5 = vrot.slane %v1860_v11, 2  ;;  %v1881_v32 = vadd.f32 %v1880_v14, %v1879_v7 }
 0x3bf   : > { %v1862_v53 = vadd.f32 %v1861_v5, %v1860_v11  ;;  %v1882_v4 = vrot.slane %v1881_v32, 2 }
 0x3c1   : > { %v1863_v1 = vrot.slane %v1862_v53, 1  ;;  %v1883_v8 = vadd.f32 %v1882_v4, %v1881_v32 }
 0x3c3   : > { %v1864_v28 = vadd.f32 %v1863_v1, %v1862_v53  ;;  %v1884_v50 = vrot.slane %v1883_v8, 1 }
 0x3c5   : > { %v1896_v63 = vadd.f32 %v1895_v44, %v1864_v28  ;;  %v1885_v57 = vadd.f32 %v1884_v50, %v1883_v8 }
 0x3c7   : > { %v1900_v48 = vand.u32 2147483647, %v1896_v63  ;;  %v1897_v55 = vadd.f32 %v1895_v44, %v1885_v57  ;;  %v1898_v60 = vmax.f32 %v1896_v63, 0.0 }
 0x3c9   : > { %v1902_v13 = vsub.f32 0.0, %v1900_v48  ;;  %v1901_v39 = vand.u32 2147483647, %v1897_v55  ;;  %v1899_v43 = vmax.f32 %v1897_v55, 0.0 }
 0x3cb   : > { %v1904_v38 = vmul.f32 1.442695, %v1902_v13  ;;  %v1903_v2 = vsub.f32 0.0, %v1901_v39 }
 0x3cd   : > { %2163 = vpow2.f32 %v1904_v38  ;;  %v1906_v45 = vmul.f32 1.442695, %v1903_v2 }
 0x3cf   : > { %2165 = vpow2.f32 %v1906_v45 }
 0x3da   : > { %v2164_v34 = vpop.eup %2163 }
 0x3db   : > { %v1908_v37 = vadd.f32 1.0, %v2164_v34  ;;  %v1911_v24 = vmul.f32 -0.5, %v2164_v34  ;;  %v1914_v49 = vand.u32 2147483647, %v2164_v34 }
 0x3dc   : > { %v2166_v18 = vpop.eup %2165 }
 0x3dd   : > { %2167 = vlog2.f32 %v1908_v37  ;;  %v1917_v22 = vadd.f32 1.0, %v2166_v18  ;;  %v1920_v23 = vmul.f32 -0.5, %v2166_v18  ;;  %v1912_v35 = vadd.f32 1.0, %v1911_v24 }
 0x3de   : > { %v1923_v46 = vand.u32 2147483647, %v2166_v18  ;;  %vm1915_vm2 = vcmp.lt.f32.partialorder %v1914_v49, 0.0004427343 }
 0x3df   : > { %2169 = vlog2.f32 %v1917_v22  ;;  %v1921_v58 = vadd.f32 1.0, %v1920_v23  ;;  %v1913_v25 = vmul.f32 %v2164_v34, %v1912_v35 }
 0x3e0   : > { %vm1924_vm3 = vcmp.lt.f32.partialorder %v1923_v46, 0.0004427343 }
 0x3e1   : > { %v1922_v27 = vmul.f32 %v2166_v18, %v1921_v58 }
 0x3ea   : > { %v2168_v61 = vpop.eup %2167 }
 0x3eb   : > { %v1910_v40 = vmul.f32 0.6931472, %v2168_v61 }
 0x3ec   : > { %v2170_v47 = vpop.eup %2169 }
 0x3ed   : > { %v1916_v31 = vsel %vm1915_vm2, %v1913_v25, %v1910_v40  ;;  %v1919_v9 = vmul.f32 0.6931472, %v2170_v47 }
 0x3ee   : > { %v1926_v36 = vadd.f32 %v1916_v31, %v1898_v60 }
 0x3ef   : > { %v1925_v30 = vsel %vm1924_vm3, %v1922_v27, %v1919_v9 }
 0x3f0   : > { %v1927_v0 = vadd.f32 %v1925_v30, %v1899_v43  ;;  %v1928_v20 = vmul.f32 %v1926_v36, %v3352_v10 }
 0x3f2   : > { %v1929_v12 = vmul.f32 %v1927_v0, %v3353_v33 }
 0x3f4   : > { %v1930_v26 = vadd.f32 %v1929_v12, %v1928_v20 }
 0x3f6   : > { %1931 = vst [vmem:[%s351_s10] sm:$0x1] %v1930_v26 }
 0x3f7   : > { %2184 = shalt.err (!%p2181_p5)
}
 0x3f8   : > { %s2185_s28 = scalar_lea.hbm %s1944_s21, 16  ;;  %s2189_s10 = scalar_lea.hbm %s3322_s9, 32 }
 0x3f9   : > { %p2186_p6 = scmp.ne.s32.totalorder %s1944_s21, %s2185_s28  ;;  %p2190_p10 = scmp.lt.s32.totalorder %s1944_s21, %s3322_s9 }
 0x3fa   : > { %p2191_p11 = scmp.lt.s32.totalorder %s2189_s10, %s2185_s28 }
 0x3fb   : > { %p2187_p7 = pnand %p2186_p6, %p2347_p4 }
 0x3fc   : > { %p2192_p12 = por %p2191_p11, %p2190_p10 }
 0x3fd   : > { %p2188_p9 = pneg %p2187_p7 }
 0x3ff   : > { %p2193_p13 = pnand %p2192_p12, %p2188_p9 }
 0x401   : > { %2196 = shalt.err (!%p2193_p13)
}
 0x402   : > { %2043 = dma.vmem_to_hbm [thread:$0]  (%p2347_p4), %s1947_s8, 16, %s1944_s21, %s1933_s24  }
 0x403 PF: > { %p2049_p0 = scmp.ge.s32.totalorder %s2247_s16, 2  ;;  %s1958_s25 = sand.u32 1, %s2227_s11  }
 0x404   : > { %s1959_s14 = scalar_lea.sflag [#allocation4], %s1958_s25 }
 0x405   : > { %p2046_p1 = pnand %p2049_p0, %p2354_p8 }
 0x407   : > { %p2047_p2 = pneg %p2046_p1 }
 0x409   : > { %2222 = dma.done.wait (%p2047_p2), %s1959_s14, 16  }
 0x40a   : > { %2224 = vsyncadd (%p2047_p2), %s1959_s14, 4294967280  ;;  %s24_s16 = sadd.s32 1, %s2247_s16   ;;  %s3354_s11 = smov %s2231_s12 }
 0x40b   : > { %p21_p3 = scmp.ge.s32.totalorder %s24_s16, 4   ;;  %s3355_s12 = smov %s2235_s13 }
 0x40c   : > { %s3356_s13 = smov %s2360_s23  ;;  %s3357_s14 = smov %s2243_s15 }
 0x40d   : > { %s3358_s15 = smov %s3360_s18  ;;  %23 = sbr.rel (!%p21_p3) target bundleno = 7 (0x7), region = 91 }
 0x412   :  { %1963 = vsyncpa [#allocation4], 1 }
 0x413   :  { %1965 = vsyncpa [#allocation4 + $0x1], 1 }

</bundles_post_ra>
